<compile_context>
chip_gen: v7x
topology: tpu7x:2x2x1
jax: 0.10.0
libtpu: 0.0.40
codegen_flags: <defaults>
</compile_context>

<pallas_src>
import functools

import jax
import jax.numpy as jnp
from jax import lax
from jax.experimental import pallas as pl
from jax.experimental.pallas import tpu as pltpu


_LN_EPS = 1e-5  # PyTorch nn.LayerNorm default


@functools.lru_cache(maxsize=None)
def _vmem_limit_bytes():
    """Generation-dependent VMEM cap: ~3/4 of physical VMEM (48 MiB on v7x,
    96 MiB on v5e/v6e)."""
    cap = None
    try:
        info = pltpu.get_tpu_info()
        cap = getattr(info, "vmem_capacity_bytes", None)
    except Exception:
        cap = None
    if not cap:
        cap = 64 * 1024 * 1024
    return int(cap) * 3 // 4


def _ln(x, g, b):
    """LayerNorm over last dim in f32. x:(S,W), g/b:(1,W)."""
    mean = jnp.mean(x, axis=-1, keepdims=True)
    var = jnp.mean(jnp.square(x - mean), axis=-1, keepdims=True)
    return (x - mean) * lax.rsqrt(var + _LN_EPS) * g + b


# ----------------------------- Pallas kernels ------------------------------

def _embed_kernel(p_ref, w_ref, cls_ref, pos_ref, g_ref, b_ref, o_ref):
    """Per image: patch matmul + [cls; patches] + pos embed + ln_pre.
    Class row and patch rows are written separately (no sublane concat)."""
    f32 = jnp.float32
    g = g_ref[...].astype(f32)
    b = b_ref[...].astype(f32)
    pos = pos_ref[...].astype(f32)                               # (S, W)
    npatch = p_ref.shape[0]

    # class-token row (row 0)
    c = cls_ref[...].astype(f32) + pos[0:1, :]
    o_ref[pl.ds(0, 1), :] = _ln(c, g, b).astype(o_ref.dtype)

    # patch rows (rows 1..S-1)
    emb = jnp.dot(p_ref[...], w_ref[...], preferred_element_type=f32)  # (NP, W)
    xp = emb + pos[1:, :]
    o_ref[pl.ds(1, npatch), :] = _ln(xp, g, b).astype(o_ref.dtype)


def _tx_kernel(x_ref, ln1g_ref, ln1b_ref, wq_ref, wk_ref, wv_ref,
               bq_ref, bk_ref, bv_ref, wo_ref, bo_ref,
               ln2g_ref, ln2b_ref, wfc_ref, bfc_ref, wpr_ref, bpr_ref,
               lnpg_ref, lnpb_ref, proj_ref, o_ref, resid_ref, *, heads):
    """One grid step = one residual attention block for one image.
    grid = (batch, layer); the residual stream is carried in an f32 VMEM
    scratch across the layer axis.  At the last layer, ln_post + projection of
    the class token is written straight to the (1, out_dim) output block."""
    f32, bf16 = jnp.float32, jnp.bfloat16
    l = pl.program_id(1)
    n_layers = pl.num_programs(1)
    S, W = resid_ref.shape

    # Layer 0 of each image: pull embedded tokens into the f32 residual scratch.
    @pl.when(l == 0)
    def _():
        resid_ref[...] = x_ref[...].astype(f32)

    x = resid_ref[...]                                           # (S, W) f32

    # ---- multi-head self-attention (pre-LN, residual) ----
    y = _ln(x, ln1g_ref[...].astype(f32), ln1b_ref[...].astype(f32)).astype(bf16)
    attn = jnp.broadcast_to(bo_ref[...].astype(f32), (S, W))     # start from out-proj bias
    for h in range(heads):                                       # static unroll
        # Per-head projections come straight out of the MXU lane-dense
        # (weights pre-split per head; 1/sqrt(hd) already folded into wq/bq).
        q = jnp.dot(y, wq_ref[h], preferred_element_type=f32) + bq_ref[h]
        k = jnp.dot(y, wk_ref[h], preferred_element_type=f32) + bk_ref[h]
        v = jnp.dot(y, wv_ref[h], preferred_element_type=f32) + bv_ref[h]
        s = lax.dot_general(q.astype(bf16), k.astype(bf16),
                            (((1,), (1,)), ((), ())),
                            preferred_element_type=f32)          # (S, S) f32
        s = s - jnp.max(s, axis=-1, keepdims=True)
        p = jnp.exp(s)
        p = p * pl.reciprocal(jnp.sum(p, axis=-1, keepdims=True), approx=True)
        ctx = jnp.dot(p.astype(bf16), v.astype(bf16),
                      preferred_element_type=f32)                # (S, hd)
        # Accumulate through the per-head out-proj slab: no concat, every
        # matmul output stays W-lane dense.
        attn = attn + jnp.dot(ctx.astype(bf16), wo_ref[h],
                              preferred_element_type=f32)
    x = x + attn

    # ---- MLP (pre-LN, residual): fc -> QuickGELU -> proj ----
    y = _ln(x, ln2g_ref[...].astype(f32), ln2b_ref[...].astype(f32)).astype(bf16)
    h1 = jnp.dot(y, wfc_ref[...], preferred_element_type=f32) + bfc_ref[...]
    h1 = h1 * jax.nn.sigmoid(1.702 * h1)                         # QuickGELU (CLIP)
    h2 = jnp.dot(h1.astype(bf16), wpr_ref[...],
                 preferred_element_type=f32) + bpr_ref[...]
    x = x + h2
    resid_ref[...] = x

    # Last layer: ln_post(class token) + bias-free projection.
    @pl.when(l == n_layers - 1)
    def _():
        cls = x[0:1, :]                                          # (1, W) f32
        yc = _ln(cls, lnpg_ref[...].astype(f32), lnpb_ref[...].astype(f32))
        o_ref[...] = jnp.dot(yc, proj_ref[...].astype(f32),
                             preferred_element_type=f32).astype(o_ref.dtype)


# ----------------------------- Pallas wrappers ------------------------------

def patch_embed(patches, w, cls, pos, g, b):
    """patches:(B,NP,CPP) bf16 -> (B,S,W) bf16 (embed + cls + pos + ln_pre)."""
    B, NP, CPP = patches.shape
    S, W = pos.shape

    def inv(*shape):
        n = len(shape)
        return pl.BlockSpec(shape, lambda i, n=n: (0,) * n)

    return pl.pallas_call(
        _embed_kernel,
        grid=(B,),
        in_specs=[
            pl.BlockSpec((None, NP, CPP), lambda i: (i, 0, 0)),
            inv(CPP, W), inv(1, W), inv(S, W), inv(1, W), inv(1, W),
        ],
        out_specs=pl.BlockSpec((None, S, W), lambda i: (i, 0, 0)),
        out_shape=jax.ShapeDtypeStruct((B, S, W), jnp.bfloat16),
        compiler_params=pltpu.CompilerParams(
            dimension_semantics=("parallel",),
            vmem_limit_bytes=_vmem_limit_bytes()),
    )(patches, w, cls, pos, g, b)


def transformer_encode(x, params):
    """All transformer layers + ln_post + projection in ONE pallas_call.
    grid = (batch 'parallel', layer 'arbitrary'); per-layer weight stacks are
    auto-pipelined along the layer axis (layer l+1 weights prefetched during
    layer l compute)."""
    B, S, W = x.shape
    heads = params["heads"]
    hd = W // heads
    L = params["wq"].shape[0]
    d4 = 4 * W
    out_dim = params["proj"].shape[1]

    def per_layer(*shape):
        n = len(shape)
        return pl.BlockSpec((None,) + shape, lambda b, l, n=n: (l,) + (0,) * n)

    def invariant(*shape):
        n = len(shape)
        return pl.BlockSpec(shape, lambda b, l, n=n: (0,) * n)

    in_specs = [
        pl.BlockSpec((None, S, W), lambda b, l: (b, 0, 0)),      # embedded tokens
        per_layer(1, W), per_layer(1, W),                        # ln1 g/b
        per_layer(heads, W, hd), per_layer(heads, W, hd), per_layer(heads, W, hd),
        per_layer(heads, 1, hd), per_layer(heads, 1, hd), per_layer(heads, 1, hd),
        per_layer(heads, hd, W), per_layer(1, W),                # wo, bo
        per_layer(1, W), per_layer(1, W),                        # ln2 g/b
        per_layer(W, d4), per_layer(1, d4),                      # wfc, bfc
        per_layer(d4, W), per_layer(1, W),                       # wpr, bpr
        invariant(1, W), invariant(1, W),                        # ln_post g/b
        invariant(W, out_dim),                                   # proj
    ]

    kernel = functools.partial(_tx_kernel, heads=heads)
    out = pl.pallas_call(
        kernel,
        grid=(B, L),
        in_specs=in_specs,
        out_specs=pl.BlockSpec((None, 1, out_dim), lambda b, l: (b, 0, 0)),
        out_shape=jax.ShapeDtypeStruct((B, 1, out_dim), jnp.float32),
        scratch_shapes=[pltpu.VMEM((S, W), jnp.float32)],        # residual stream
        compiler_params=pltpu.CompilerParams(
            dimension_semantics=("parallel", "arbitrary"),
            vmem_limit_bytes=_vmem_limit_bytes()),
    )(x, params["ln1_g"], params["ln1_b"], params["wq"], params["wk"],
      params["wv"], params["bq"], params["bk"], params["bv"], params["wo"],
      params["bo"], params["ln2_g"], params["ln2_b"], params["wfc"],
      params["bfc"], params["wpr"], params["bpr"], params["ln_post_g"],
      params["ln_post_b"], params["proj"])
    return out[:, 0, :]                                          # (B, out_dim)


# ----------------------------- CLIP image encoder ---------------------------

def init_params(key, *, in_channels=3, image_size=16, patch_size=4, width=32,
                layers=2, heads=2, output_dim=16):
    """Parameters already in kernel-friendly layout:
       - per-layer stacks with a leading L axis (layer grid axis);
       - q/k/v and out-proj weights pre-split per head;
       - 1/sqrt(hd) folded into the Q weights + bias;
       - matmul weights bf16, biases / LN affines / embeddings f32."""
    num_patches = (image_size // patch_size) ** 2
    seq = num_patches + 1
    hd = width // heads
    std = width ** -0.5
    scale = hd ** -0.5
    cpp = in_channels * patch_size * patch_size

    keys = iter(jax.random.split(key, 12))

    def nrm(shape, scl):
        return scl * jax.random.normal(next(keys), shape, jnp.float32)

    params = {
        "patch_size": patch_size,
        "heads": heads,
        # conv1.weight (width, C, P, P) pre-reshaped + transposed to (C*P*P, width)
        "conv1_w": nrm((cpp, width), std).astype(jnp.bfloat16),
        "class_embedding": nrm((1, width), std),
        "positional_embedding": nrm((seq, width), 0.01),
        "ln_pre_g": jnp.ones((1, width), jnp.float32),
        "ln_pre_b": jnp.zeros((1, width), jnp.float32),
        "ln_post_g": jnp.ones((1, width), jnp.float32),
        "ln_post_b": jnp.zeros((1, width), jnp.float32),
        "proj": nrm((width, output_dim), std),
        # ------ per-layer stacks (leading axis = layer) ------
        "ln1_g": jnp.ones((layers, 1, width), jnp.float32),
        "ln1_b": jnp.zeros((layers, 1, width), jnp.float32),
        # in_proj_weight (3W, W) -> per-head (W, hd) slabs; attention scale
        # folded into Q weight (and Q bias, zero here).
        "wq": (nrm((layers, heads, width, hd), std) * scale).astype(jnp.bfloat16),
        "wk": nrm((layers, heads, width, hd), std).astype(jnp.bfloat16),
        "wv": nrm((layers, heads, width, hd), std).astype(jnp.bfloat16),
        "bq": jnp.zeros((layers, heads, 1, hd), jnp.float32) * scale,
        "bk": jnp.zeros((layers, heads, 1, hd), jnp.float32),
        "bv": jnp.zeros((layers, heads, 1, hd), jnp.float32),
        # out_proj.weight (W, W) -> per-head (hd, W) slabs (accumulate-through-Wo)
        "wo": nrm((layers, heads, hd, width), std).astype(jnp.bfloat16),
        "bo": jnp.zeros((layers, 1, width), jnp.float32),
        "ln2_g": jnp.ones((layers, 1, width), jnp.float32),
        "ln2_b": jnp.zeros((layers, 1, width), jnp.float32),
        "wfc": nrm((layers, width, 4 * width), std).astype(jnp.bfloat16),
        "bfc": jnp.zeros((layers, 1, 4 * width), jnp.float32),
        "wpr": nrm((layers, 4 * width, width), std).astype(jnp.bfloat16),
        "bpr": jnp.zeros((layers, 1, width), jnp.float32),
    }
    return params


def encode_image(params, image):
    """ImageCLIP.forward: returns model.encode_image(image) -> (B, output_dim)."""
    B, C, H, Wimg = image.shape
    P = params["patch_size"]
    gh, gw = H // P, Wimg // P
    npatch = gh * gw

    # Conv2d(kernel=stride=P, bias=False) == patch extraction (layout glue) + matmul.
    x = image.reshape(B, C, gh, P, gw, P)
    x = x.transpose(0, 2, 4, 1, 3, 5).reshape(B, npatch, C * P * P)
    x = x.astype(jnp.bfloat16)

    # Fused: patch matmul + class token + positional embedding + ln_pre.
    x = patch_embed(x, params["conv1_w"], params["class_embedding"],
                    params["positional_embedding"],
                    params["ln_pre_g"], params["ln_pre_b"])      # (B, S, W) bf16

    # Fused transformer (all layers) + ln_post + projection.
    return transformer_encode(x, params)                         # (B, out_dim) f32


class ImageCLIP:
    """Mirrors the PyTorch wrapper: forward(image) = model.encode_image(image)."""

    def __init__(self, params):
        self.params = params
        self._fn = jax.jit(functools.partial(encode_image, params))

    def __call__(self, image):
        return self._fn(image)


# ----------------------------------- main -----------------------------------

if __name__ == "__main__":
    key = jax.random.PRNGKey(0)
    k_param, k_img = jax.random.split(key)

    B, C, H, W = 2, 3, 16, 16
    params = init_params(k_param, in_channels=C, image_size=H, patch_size=4,
                         width=32, layers=2, heads=2, output_dim=16)
    image = jax.random.normal(k_img, (B, C, H, W), dtype=jnp.float32)

    model = ImageCLIP(params)
    feats = jax.block_until_ready(model(image))                  # (2, 16) image features
    assert feats.shape == (B, 16)
    assert bool(jnp.all(jnp.isfinite(feats)))
    print("KERNEL_OK")
</pallas_src>

<mosaic_0001>
module attributes {stable_mosaic.version = 11 : i64} {
  func.func @_tx_kernel(%arg0: i32, %arg1: i32, %arg2: memref<1x17x32xbf16, #tpu.memory_space<vmem>>, %arg3: memref<1x1x32xf32, #tpu.memory_space<vmem>>, %arg4: memref<1x1x32xf32, #tpu.memory_space<vmem>>, %arg5: memref<1x2x32x16xbf16, #tpu.memory_space<vmem>>, %arg6: memref<1x2x32x16xbf16, #tpu.memory_space<vmem>>, %arg7: memref<1x2x32x16xbf16, #tpu.memory_space<vmem>>, %arg8: memref<1x2x1x16xf32, #tpu.memory_space<vmem>>, %arg9: memref<1x2x1x16xf32, #tpu.memory_space<vmem>>, %arg10: memref<1x2x1x16xf32, #tpu.memory_space<vmem>>, %arg11: memref<1x2x16x32xbf16, #tpu.memory_space<vmem>>, %arg12: memref<1x1x32xf32, #tpu.memory_space<vmem>>, %arg13: memref<1x1x32xf32, #tpu.memory_space<vmem>>, %arg14: memref<1x1x32xf32, #tpu.memory_space<vmem>>, %arg15: memref<1x32x128xbf16, #tpu.memory_space<vmem>>, %arg16: memref<1x1x128xf32, #tpu.memory_space<vmem>>, %arg17: memref<1x128x32xbf16, #tpu.memory_space<vmem>>, %arg18: memref<1x1x32xf32, #tpu.memory_space<vmem>>, %arg19: memref<1x32xf32, #tpu.memory_space<vmem>>, %arg20: memref<1x32xf32, #tpu.memory_space<vmem>>, %arg21: memref<32x16xf32, #tpu.memory_space<vmem>>, %arg22: memref<1x1x16xf32, #tpu.memory_space<vmem>>, %arg23: memref<17x32xf32, #tpu.memory_space<vmem>>) attributes {dimension_semantics = [#tpu.dimension_semantics<parallel>, #tpu.dimension_semantics<arbitrary>], iteration_bounds = array<i64: 2, 2>, scalar_prefetch = 0 : i64, scratch_operands = 1 : i64, tpu.core_type = #tpu.core_type<tc>, window_params = [{transform_indices = @transform_0, window_bounds = array<i64: 1, 17, 32>}, {transform_indices = @transform_1, window_bounds = array<i64: 1, 1, 32>}, {transform_indices = @transform_2, window_bounds = array<i64: 1, 1, 32>}, {transform_indices = @transform_3, window_bounds = array<i64: 1, 2, 32, 16>}, {transform_indices = @transform_4, window_bounds = array<i64: 1, 2, 32, 16>}, {transform_indices = @transform_5, window_bounds = array<i64: 1, 2, 32, 16>}, {transform_indices = @transform_6, window_bounds = array<i64: 1, 2, 1, 16>}, {transform_indices = @transform_7, window_bounds = array<i64: 1, 2, 1, 16>}, {transform_indices = @transform_8, window_bounds = array<i64: 1, 2, 1, 16>}, {transform_indices = @transform_9, window_bounds = array<i64: 1, 2, 16, 32>}, {transform_indices = @transform_10, window_bounds = array<i64: 1, 1, 32>}, {transform_indices = @transform_11, window_bounds = array<i64: 1, 1, 32>}, {transform_indices = @transform_12, window_bounds = array<i64: 1, 1, 32>}, {transform_indices = @transform_13, window_bounds = array<i64: 1, 32, 128>}, {transform_indices = @transform_14, window_bounds = array<i64: 1, 1, 128>}, {transform_indices = @transform_15, window_bounds = array<i64: 1, 128, 32>}, {transform_indices = @transform_16, window_bounds = array<i64: 1, 1, 32>}, {pipeline_mode = #tpu.pipeline_mode<synchronous>, transform_indices = @transform_17, window_bounds = array<i64: 1, 32>}, {pipeline_mode = #tpu.pipeline_mode<synchronous>, transform_indices = @transform_18, window_bounds = array<i64: 1, 32>}, {pipeline_mode = #tpu.pipeline_mode<synchronous>, transform_indices = @transform_19, window_bounds = array<i64: 32, 16>}, {transform_indices = @transform_20, window_bounds = array<i64: 1, 1, 16>}]} {
    %c0_i32 = arith.constant 0 : i32
    %0 = arith.cmpi eq, %arg1, %c0_i32 : i32
    %1 = arith.extui %0 : i1 to i32
    %c0_i32_0 = arith.constant 0 : i32
    %2 = arith.cmpi ne, %1, %c0_i32_0 : i32
    scf.if %2 {
      %c0_116 = arith.constant 0 : index
      %c0_117 = arith.constant 0 : index
      %c0_118 = arith.constant 0 : index
      %175 = vector.load %arg2[%c0_116, %c0_117, %c0_118] : memref<1x17x32xbf16, #tpu.memory_space<vmem>>, vector<1x17x32xbf16>
      %176 = vector.shape_cast %175 : vector<1x17x32xbf16> to vector<17x32xbf16>
      %177 = arith.extf %176 : vector<17x32xbf16> to vector<17x32xf32>
      %c0_119 = arith.constant 0 : index
      %c0_120 = arith.constant 0 : index
      %178 = vector.load %arg23[%c0_119, %c0_120] : memref<17x32xf32, #tpu.memory_space<vmem>>, vector<17x32xf32>
      tpu.vector_store %arg23[%c0_119, %c0_120], %177 {strides = array<i32>} : memref<17x32xf32, #tpu.memory_space<vmem>>, vector<17x32xf32>,
    } else {
    }
    %c0 = arith.constant 0 : index
    %c0_1 = arith.constant 0 : index
    %3 = vector.load %arg23[%c0, %c0_1] : memref<17x32xf32, #tpu.memory_space<vmem>>, vector<17x32xf32>
    %c0_2 = arith.constant 0 : index
    %c0_3 = arith.constant 0 : index
    %c0_4 = arith.constant 0 : index
    %4 = vector.load %arg3[%c0_2, %c0_3, %c0_4] : memref<1x1x32xf32, #tpu.memory_space<vmem>>, vector<1x1x32xf32>
    %5 = vector.shape_cast %4 : vector<1x1x32xf32> to vector<1x32xf32>
    %c0_5 = arith.constant 0 : index
    %c0_6 = arith.constant 0 : index
    %c0_7 = arith.constant 0 : index
    %6 = vector.load %arg4[%c0_5, %c0_6, %c0_7] : memref<1x1x32xf32, #tpu.memory_space<vmem>>, vector<1x1x32xf32>
    %7 = vector.shape_cast %6 : vector<1x1x32xf32> to vector<1x32xf32>
    %cst = arith.constant dense<0.000000e+00> : vector<17xf32>
    %8 = vector.multi_reduction <add>, %3, %cst [1] : vector<17x32xf32> to vector<17xf32>
    %9 = vector.shape_cast %8 : vector<17xf32> to vector<17x1xf32>
    %cst_8 = arith.constant 3.200000e+01 : f32
    %10 = vector.broadcast %cst_8 : f32 to vector<17x1xf32>
    %11 = arith.divf %9, %10 : vector<17x1xf32>
    %12 = vector.broadcast %11 : vector<17x1xf32> to vector<17x32xf32>
    %13 = arith.subf %3, %12 : vector<17x32xf32>
    %14 = arith.mulf %13, %13 : vector<17x32xf32>
    %cst_9 = arith.constant dense<0.000000e+00> : vector<17xf32>
    %15 = vector.multi_reduction <add>, %14, %cst_9 [1] : vector<17x32xf32> to vector<17xf32>
    %16 = vector.shape_cast %15 : vector<17xf32> to vector<17x1xf32>
    %cst_10 = arith.constant 3.200000e+01 : f32
    %17 = vector.broadcast %cst_10 : f32 to vector<17x1xf32>
    %18 = arith.divf %16, %17 : vector<17x1xf32>
    %19 = vector.broadcast %11 : vector<17x1xf32> to vector<17x32xf32>
    %20 = arith.subf %3, %19 : vector<17x32xf32>
    %cst_11 = arith.constant 9.99999974E-6 : f32
    %21 = vector.broadcast %cst_11 : f32 to vector<17x1xf32>
    %22 = arith.addf %18, %21 : vector<17x1xf32>
    %23 = math.rsqrt %22 : vector<17x1xf32>
    %24 = vector.broadcast %23 : vector<17x1xf32> to vector<17x32xf32>
    %25 = arith.mulf %20, %24 : vector<17x32xf32>
    %26 = vector.broadcast %5 : vector<1x32xf32> to vector<17x32xf32>
    %27 = arith.mulf %25, %26 : vector<17x32xf32>
    %28 = vector.broadcast %7 : vector<1x32xf32> to vector<17x32xf32>
    %29 = arith.addf %27, %28 : vector<17x32xf32>
    %30 = arith.truncf %29 : vector<17x32xf32> to vector<17x32xbf16>
    %c0_12 = arith.constant 0 : index
    %c0_13 = arith.constant 0 : index
    %c0_14 = arith.constant 0 : index
    %31 = vector.load %arg12[%c0_12, %c0_13, %c0_14] : memref<1x1x32xf32, #tpu.memory_space<vmem>>, vector<1x1x32xf32>
    %32 = vector.shape_cast %31 : vector<1x1x32xf32> to vector<1x32xf32>
    %33 = vector.shape_cast %32 : vector<1x32xf32> to vector<1x32xf32>
    %34 = vector.broadcast %33 : vector<1x32xf32> to vector<17x32xf32>
    %c0_15 = arith.constant 0 : index
    %c0_16 = arith.constant 0 : index
    %c0_17 = arith.constant 0 : index
    %c0_18 = arith.constant 0 : index
    %35 = vector.load %arg5[%c0_15, %c0_16, %c0_17, %c0_18] : memref<1x2x32x16xbf16, #tpu.memory_space<vmem>>, vector<1x1x32x16xbf16>
    %36 = vector.shape_cast %35 : vector<1x1x32x16xbf16> to vector<32x16xbf16>
    %cst_19 = arith.constant dense<0.000000e+00> : vector<17x16xf32>
    %37 = tpu.matmul %30, %36, %cst_19 {dimension_numbers = #tpu.dot_dimension_numbers<[1], [0], [0], [1], [0, 0, 1, 1], [], []>} : vector<17x32xbf16>, vector<32x16xbf16>, vector<17x16xf32> -> vector<17x16xf32>
    %c0_20 = arith.constant 0 : index
    %c0_21 = arith.constant 0 : index
    %c0_22 = arith.constant 0 : index
    %c0_23 = arith.constant 0 : index
    %38 = vector.load %arg8[%c0_20, %c0_21, %c0_22, %c0_23] : memref<1x2x1x16xf32, #tpu.memory_space<vmem>>, vector<1x1x1x16xf32>
    %39 = vector.shape_cast %38 : vector<1x1x1x16xf32> to vector<1x16xf32>
    %40 = vector.broadcast %39 : vector<1x16xf32> to vector<17x16xf32>
    %41 = arith.addf %37, %40 : vector<17x16xf32>
    %c0_24 = arith.constant 0 : index
    %c0_25 = arith.constant 0 : index
    %c0_26 = arith.constant 0 : index
    %c0_27 = arith.constant 0 : index
    %42 = vector.load %arg6[%c0_24, %c0_25, %c0_26, %c0_27] : memref<1x2x32x16xbf16, #tpu.memory_space<vmem>>, vector<1x1x32x16xbf16>
    %43 = vector.shape_cast %42 : vector<1x1x32x16xbf16> to vector<32x16xbf16>
    %cst_28 = arith.constant dense<0.000000e+00> : vector<17x16xf32>
    %44 = tpu.matmul %30, %43, %cst_28 {dimension_numbers = #tpu.dot_dimension_numbers<[1], [0], [0], [1], [0, 0, 1, 1], [], []>} : vector<17x32xbf16>, vector<32x16xbf16>, vector<17x16xf32> -> vector<17x16xf32>
    %c0_29 = arith.constant 0 : index
    %c0_30 = arith.constant 0 : index
    %c0_31 = arith.constant 0 : index
    %c0_32 = arith.constant 0 : index
    %45 = vector.load %arg9[%c0_29, %c0_30, %c0_31, %c0_32] : memref<1x2x1x16xf32, #tpu.memory_space<vmem>>, vector<1x1x1x16xf32>
    %46 = vector.shape_cast %45 : vector<1x1x1x16xf32> to vector<1x16xf32>
    %47 = vector.broadcast %46 : vector<1x16xf32> to vector<17x16xf32>
    %48 = arith.addf %44, %47 : vector<17x16xf32>
    %c0_33 = arith.constant 0 : index
    %c0_34 = arith.constant 0 : index
    %c0_35 = arith.constant 0 : index
    %c0_36 = arith.constant 0 : index
    %49 = vector.load %arg7[%c0_33, %c0_34, %c0_35, %c0_36] : memref<1x2x32x16xbf16, #tpu.memory_space<vmem>>, vector<1x1x32x16xbf16>
    %50 = vector.shape_cast %49 : vector<1x1x32x16xbf16> to vector<32x16xbf16>
    %cst_37 = arith.constant dense<0.000000e+00> : vector<17x16xf32>
    %51 = tpu.matmul %30, %50, %cst_37 {dimension_numbers = #tpu.dot_dimension_numbers<[1], [0], [0], [1], [0, 0, 1, 1], [], []>} : vector<17x32xbf16>, vector<32x16xbf16>, vector<17x16xf32> -> vector<17x16xf32>
    %c0_38 = arith.constant 0 : index
    %c0_39 = arith.constant 0 : index
    %c0_40 = arith.constant 0 : index
    %c0_41 = arith.constant 0 : index
    %52 = vector.load %arg10[%c0_38, %c0_39, %c0_40, %c0_41] : memref<1x2x1x16xf32, #tpu.memory_space<vmem>>, vector<1x1x1x16xf32>
    %53 = vector.shape_cast %52 : vector<1x1x1x16xf32> to vector<1x16xf32>
    %54 = vector.broadcast %53 : vector<1x16xf32> to vector<17x16xf32>
    %55 = arith.addf %51, %54 : vector<17x16xf32>
    %56 = arith.truncf %41 : vector<17x16xf32> to vector<17x16xbf16>
    %57 = arith.truncf %48 : vector<17x16xf32> to vector<17x16xbf16>
    %cst_42 = arith.constant dense<0.000000e+00> : vector<17x17xf32>
    %58 = tpu.matmul %56, %57, %cst_42 {dimension_numbers = #tpu.dot_dimension_numbers<[1], [1], [0], [0], [0, 0, 1, 0], [], []>} : vector<17x16xbf16>, vector<17x16xbf16>, vector<17x17xf32> -> vector<17x17xf32>
    %cst_43 = arith.constant dense<0xFF800000> : vector<17xf32>
    %59 = vector.multi_reduction <maximumf>, %58, %cst_43 [1] : vector<17x17xf32> to vector<17xf32>
    %60 = vector.shape_cast %59 : vector<17xf32> to vector<17x1xf32>
    %61 = vector.broadcast %60 : vector<17x1xf32> to vector<17x17xf32>
    %62 = arith.subf %58, %61 : vector<17x17xf32>
    %63 = math.exp %62 : vector<17x17xf32>
    %cst_44 = arith.constant dense<0.000000e+00> : vector<17xf32>
    %64 = vector.multi_reduction <add>, %63, %cst_44 [1] : vector<17x17xf32> to vector<17xf32>
    %65 = vector.shape_cast %64 : vector<17xf32> to vector<17x1xf32>
    %66 = tpu.reciprocal %65 {approx = true} : vector<17x1xf32> -> vector<17x1xf32>
    %67 = vector.broadcast %66 : vector<17x1xf32> to vector<17x17xf32>
    %68 = arith.mulf %63, %67 : vector<17x17xf32>
    %69 = arith.truncf %68 : vector<17x17xf32> to vector<17x17xbf16>
    %70 = arith.truncf %55 : vector<17x16xf32> to vector<17x16xbf16>
    %cst_45 = arith.constant dense<0.000000e+00> : vector<17x16xf32>
    %71 = tpu.matmul %69, %70, %cst_45 {dimension_numbers = #tpu.dot_dimension_numbers<[1], [0], [0], [1], [0, 0, 1, 1], [], []>} : vector<17x17xbf16>, vector<17x16xbf16>, vector<17x16xf32> -> vector<17x16xf32>
    %72 = arith.truncf %71 : vector<17x16xf32> to vector<17x16xbf16>
    %c0_46 = arith.constant 0 : index
    %c0_47 = arith.constant 0 : index
    %c0_48 = arith.constant 0 : index
    %c0_49 = arith.constant 0 : index
    %73 = vector.load %arg11[%c0_46, %c0_47, %c0_48, %c0_49] : memref<1x2x16x32xbf16, #tpu.memory_space<vmem>>, vector<1x1x16x32xbf16>
    %74 = vector.shape_cast %73 : vector<1x1x16x32xbf16> to vector<16x32xbf16>
    %cst_50 = arith.constant dense<0.000000e+00> : vector<17x32xf32>
    %75 = tpu.matmul %72, %74, %cst_50 {dimension_numbers = #tpu.dot_dimension_numbers<[1], [0], [0], [1], [0, 0, 1, 1], [], []>} : vector<17x16xbf16>, vector<16x32xbf16>, vector<17x32xf32> -> vector<17x32xf32>
    %76 = arith.addf %34, %75 : vector<17x32xf32>
    %c0_51 = arith.constant 0 : index
    %c1 = arith.constant 1 : index
    %c0_52 = arith.constant 0 : index
    %c0_53 = arith.constant 0 : index
    %77 = vector.load %arg5[%c0_51, %c1, %c0_52, %c0_53] : memref<1x2x32x16xbf16, #tpu.memory_space<vmem>>, vector<1x1x32x16xbf16>
    %78 = vector.shape_cast %77 : vector<1x1x32x16xbf16> to vector<32x16xbf16>
    %cst_54 = arith.constant dense<0.000000e+00> : vector<17x16xf32>
    %79 = tpu.matmul %30, %78, %cst_54 {dimension_numbers = #tpu.dot_dimension_numbers<[1], [0], [0], [1], [0, 0, 1, 1], [], []>} : vector<17x32xbf16>, vector<32x16xbf16>, vector<17x16xf32> -> vector<17x16xf32>
    %c0_55 = arith.constant 0 : index
    %c1_56 = arith.constant 1 : index
    %c0_57 = arith.constant 0 : index
    %c0_58 = arith.constant 0 : index
    %80 = vector.load %arg8[%c0_55, %c1_56, %c0_57, %c0_58] : memref<1x2x1x16xf32, #tpu.memory_space<vmem>>, vector<1x1x1x16xf32>
    %81 = vector.shape_cast %80 : vector<1x1x1x16xf32> to vector<1x16xf32>
    %82 = vector.broadcast %81 : vector<1x16xf32> to vector<17x16xf32>
    %83 = arith.addf %79, %82 : vector<17x16xf32>
    %c0_59 = arith.constant 0 : index
    %c1_60 = arith.constant 1 : index
    %c0_61 = arith.constant 0 : index
    %c0_62 = arith.constant 0 : index
    %84 = vector.load %arg6[%c0_59, %c1_60, %c0_61, %c0_62] : memref<1x2x32x16xbf16, #tpu.memory_space<vmem>>, vector<1x1x32x16xbf16>
    %85 = vector.shape_cast %84 : vector<1x1x32x16xbf16> to vector<32x16xbf16>
    %cst_63 = arith.constant dense<0.000000e+00> : vector<17x16xf32>
    %86 = tpu.matmul %30, %85, %cst_63 {dimension_numbers = #tpu.dot_dimension_numbers<[1], [0], [0], [1], [0, 0, 1, 1], [], []>} : vector<17x32xbf16>, vector<32x16xbf16>, vector<17x16xf32> -> vector<17x16xf32>
    %c0_64 = arith.constant 0 : index
    %c1_65 = arith.constant 1 : index
    %c0_66 = arith.constant 0 : index
    %c0_67 = arith.constant 0 : index
    %87 = vector.load %arg9[%c0_64, %c1_65, %c0_66, %c0_67] : memref<1x2x1x16xf32, #tpu.memory_space<vmem>>, vector<1x1x1x16xf32>
    %88 = vector.shape_cast %87 : vector<1x1x1x16xf32> to vector<1x16xf32>
    %89 = vector.broadcast %88 : vector<1x16xf32> to vector<17x16xf32>
    %90 = arith.addf %86, %89 : vector<17x16xf32>
    %c0_68 = arith.constant 0 : index
    %c1_69 = arith.constant 1 : index
    %c0_70 = arith.constant 0 : index
    %c0_71 = arith.constant 0 : index
    %91 = vector.load %arg7[%c0_68, %c1_69, %c0_70, %c0_71] : memref<1x2x32x16xbf16, #tpu.memory_space<vmem>>, vector<1x1x32x16xbf16>
    %92 = vector.shape_cast %91 : vector<1x1x32x16xbf16> to vector<32x16xbf16>
    %cst_72 = arith.constant dense<0.000000e+00> : vector<17x16xf32>
    %93 = tpu.matmul %30, %92, %cst_72 {dimension_numbers = #tpu.dot_dimension_numbers<[1], [0], [0], [1], [0, 0, 1, 1], [], []>} : vector<17x32xbf16>, vector<32x16xbf16>, vector<17x16xf32> -> vector<17x16xf32>
    %c0_73 = arith.constant 0 : index
    %c1_74 = arith.constant 1 : index
    %c0_75 = arith.constant 0 : index
    %c0_76 = arith.constant 0 : index
    %94 = vector.load %arg10[%c0_73, %c1_74, %c0_75, %c0_76] : memref<1x2x1x16xf32, #tpu.memory_space<vmem>>, vector<1x1x1x16xf32>
    %95 = vector.shape_cast %94 : vector<1x1x1x16xf32> to vector<1x16xf32>
    %96 = vector.broadcast %95 : vector<1x16xf32> to vector<17x16xf32>
    %97 = arith.addf %93, %96 : vector<17x16xf32>
    %98 = arith.truncf %83 : vector<17x16xf32> to vector<17x16xbf16>
    %99 = arith.truncf %90 : vector<17x16xf32> to vector<17x16xbf16>
    %cst_77 = arith.constant dense<0.000000e+00> : vector<17x17xf32>
    %100 = tpu.matmul %98, %99, %cst_77 {dimension_numbers = #tpu.dot_dimension_numbers<[1], [1], [0], [0], [0, 0, 1, 0], [], []>} : vector<17x16xbf16>, vector<17x16xbf16>, vector<17x17xf32> -> vector<17x17xf32>
    %cst_78 = arith.constant dense<0xFF800000> : vector<17xf32>
    %101 = vector.multi_reduction <maximumf>, %100, %cst_78 [1] : vector<17x17xf32> to vector<17xf32>
    %102 = vector.shape_cast %101 : vector<17xf32> to vector<17x1xf32>
    %103 = vector.broadcast %102 : vector<17x1xf32> to vector<17x17xf32>
    %104 = arith.subf %100, %103 : vector<17x17xf32>
    %105 = math.exp %104 : vector<17x17xf32>
    %cst_79 = arith.constant dense<0.000000e+00> : vector<17xf32>
    %106 = vector.multi_reduction <add>, %105, %cst_79 [1] : vector<17x17xf32> to vector<17xf32>
    %107 = vector.shape_cast %106 : vector<17xf32> to vector<17x1xf32>
    %108 = tpu.reciprocal %107 {approx = true} : vector<17x1xf32> -> vector<17x1xf32>
    %109 = vector.broadcast %108 : vector<17x1xf32> to vector<17x17xf32>
    %110 = arith.mulf %105, %109 : vector<17x17xf32>
    %111 = arith.truncf %110 : vector<17x17xf32> to vector<17x17xbf16>
    %112 = arith.truncf %97 : vector<17x16xf32> to vector<17x16xbf16>
    %cst_80 = arith.constant dense<0.000000e+00> : vector<17x16xf32>
    %113 = tpu.matmul %111, %112, %cst_80 {dimension_numbers = #tpu.dot_dimension_numbers<[1], [0], [0], [1], [0, 0, 1, 1], [], []>} : vector<17x17xbf16>, vector<17x16xbf16>, vector<17x16xf32> -> vector<17x16xf32>
    %114 = arith.truncf %113 : vector<17x16xf32> to vector<17x16xbf16>
    %c0_81 = arith.constant 0 : index
    %c1_82 = arith.constant 1 : index
    %c0_83 = arith.constant 0 : index
    %c0_84 = arith.constant 0 : index
    %115 = vector.load %arg11[%c0_81, %c1_82, %c0_83, %c0_84] : memref<1x2x16x32xbf16, #tpu.memory_space<vmem>>, vector<1x1x16x32xbf16>
    %116 = vector.shape_cast %115 : vector<1x1x16x32xbf16> to vector<16x32xbf16>
    %cst_85 = arith.constant dense<0.000000e+00> : vector<17x32xf32>
    %117 = tpu.matmul %114, %116, %cst_85 {dimension_numbers = #tpu.dot_dimension_numbers<[1], [0], [0], [1], [0, 0, 1, 1], [], []>} : vector<17x16xbf16>, vector<16x32xbf16>, vector<17x32xf32> -> vector<17x32xf32>
    %118 = arith.addf %76, %117 : vector<17x32xf32>
    %119 = arith.addf %3, %118 : vector<17x32xf32>
    %c0_86 = arith.constant 0 : index
    %c0_87 = arith.constant 0 : index
    %c0_88 = arith.constant 0 : index
    %120 = vector.load %arg13[%c0_86, %c0_87, %c0_88] : memref<1x1x32xf32, #tpu.memory_space<vmem>>, vector<1x1x32xf32>
    %121 = vector.shape_cast %120 : vector<1x1x32xf32> to vector<1x32xf32>
    %c0_89 = arith.constant 0 : index
    %c0_90 = arith.constant 0 : index
    %c0_91 = arith.constant 0 : index
    %122 = vector.load %arg14[%c0_89, %c0_90, %c0_91] : memref<1x1x32xf32, #tpu.memory_space<vmem>>, vector<1x1x32xf32>
    %123 = vector.shape_cast %122 : vector<1x1x32xf32> to vector<1x32xf32>
    %cst_92 = arith.constant dense<0.000000e+00> : vector<17xf32>
    %124 = vector.multi_reduction <add>, %119, %cst_92 [1] : vector<17x32xf32> to vector<17xf32>
    %125 = vector.shape_cast %124 : vector<17xf32> to vector<17x1xf32>
    %cst_93 = arith.constant 3.200000e+01 : f32
    %126 = vector.broadcast %cst_93 : f32 to vector<17x1xf32>
    %127 = arith.divf %125, %126 : vector<17x1xf32>
    %128 = vector.broadcast %127 : vector<17x1xf32> to vector<17x32xf32>
    %129 = arith.subf %119, %128 : vector<17x32xf32>
    %130 = arith.mulf %129, %129 : vector<17x32xf32>
    %cst_94 = arith.constant dense<0.000000e+00> : vector<17xf32>
    %131 = vector.multi_reduction <add>, %130, %cst_94 [1] : vector<17x32xf32> to vector<17xf32>
    %132 = vector.shape_cast %131 : vector<17xf32> to vector<17x1xf32>
    %cst_95 = arith.constant 3.200000e+01 : f32
    %133 = vector.broadcast %cst_95 : f32 to vector<17x1xf32>
    %134 = arith.divf %132, %133 : vector<17x1xf32>
    %135 = vector.broadcast %127 : vector<17x1xf32> to vector<17x32xf32>
    %136 = arith.subf %119, %135 : vector<17x32xf32>
    %cst_96 = arith.constant 9.99999974E-6 : f32
    %137 = vector.broadcast %cst_96 : f32 to vector<17x1xf32>
    %138 = arith.addf %134, %137 : vector<17x1xf32>
    %139 = math.rsqrt %138 : vector<17x1xf32>
    %140 = vector.broadcast %139 : vector<17x1xf32> to vector<17x32xf32>
    %141 = arith.mulf %136, %140 : vector<17x32xf32>
    %142 = vector.broadcast %121 : vector<1x32xf32> to vector<17x32xf32>
    %143 = arith.mulf %141, %142 : vector<17x32xf32>
    %144 = vector.broadcast %123 : vector<1x32xf32> to vector<17x32xf32>
    %145 = arith.addf %143, %144 : vector<17x32xf32>
    %146 = arith.truncf %145 : vector<17x32xf32> to vector<17x32xbf16>
    %c0_97 = arith.constant 0 : index
    %c0_98 = arith.constant 0 : index
    %c0_99 = arith.constant 0 : index
    %147 = vector.load %arg15[%c0_97, %c0_98, %c0_99] : memref<1x32x128xbf16, #tpu.memory_space<vmem>>, vector<1x32x128xbf16>
    %148 = vector.shape_cast %147 : vector<1x32x128xbf16> to vector<32x128xbf16>
    %cst_100 = arith.constant dense<0.000000e+00> : vector<17x128xf32>
    %149 = tpu.matmul %146, %148, %cst_100 {dimension_numbers = #tpu.dot_dimension_numbers<[1], [0], [0], [1], [0, 0, 1, 1], [], []>} : vector<17x32xbf16>, vector<32x128xbf16>, vector<17x128xf32> -> vector<17x128xf32>
    %c0_101 = arith.constant 0 : index
    %c0_102 = arith.constant 0 : index
    %c0_103 = arith.constant 0 : index
    %150 = vector.load %arg16[%c0_101, %c0_102, %c0_103] : memref<1x1x128xf32, #tpu.memory_space<vmem>>, vector<1x1x128xf32>
    %151 = vector.shape_cast %150 : vector<1x1x128xf32> to vector<1x128xf32>
    %152 = vector.broadcast %151 : vector<1x128xf32> to vector<17x128xf32>
    %153 = arith.addf %149, %152 : vector<17x128xf32>
    %cst_104 = arith.constant 1.702000e+00 : f32
    %154 = vector.broadcast %cst_104 : f32 to vector<17x128xf32>
    %155 = arith.mulf %154, %153 : vector<17x128xf32>
    %156 = arith.negf %155 : vector<17x128xf32>
    %157 = math.exp %156 : vector<17x128xf32>
    %cst_105 = arith.constant 1.000000e+00 : f32
    %158 = vector.broadcast %cst_105 : f32 to vector<17x128xf32>
    %159 = arith.addf %158, %157 : vector<17x128xf32>
    %160 = arith.divf %158, %159 : vector<17x128xf32>
    %161 = arith.mulf %153, %160 : vector<17x128xf32>
    %162 = arith.truncf %161 : vector<17x128xf32> to vector<17x128xbf16>
    %c0_106 = arith.constant 0 : index
    %c0_107 = arith.constant 0 : index
    %c0_108 = arith.constant 0 : index
    %163 = vector.load %arg17[%c0_106, %c0_107, %c0_108] : memref<1x128x32xbf16, #tpu.memory_space<vmem>>, vector<1x128x32xbf16>
    %164 = vector.shape_cast %163 : vector<1x128x32xbf16> to vector<128x32xbf16>
    %cst_109 = arith.constant dense<0.000000e+00> : vector<17x32xf32>
    %165 = tpu.matmul %162, %164, %cst_109 {dimension_numbers = #tpu.dot_dimension_numbers<[1], [0], [0], [1], [0, 0, 1, 1], [], []>} : vector<17x128xbf16>, vector<128x32xbf16>, vector<17x32xf32> -> vector<17x32xf32>
    %c0_110 = arith.constant 0 : index
    %c0_111 = arith.constant 0 : index
    %c0_112 = arith.constant 0 : index
    %166 = vector.load %arg18[%c0_110, %c0_111, %c0_112] : memref<1x1x32xf32, #tpu.memory_space<vmem>>, vector<1x1x32xf32>
    %167 = vector.shape_cast %166 : vector<1x1x32xf32> to vector<1x32xf32>
    %168 = vector.broadcast %167 : vector<1x32xf32> to vector<17x32xf32>
    %169 = arith.addf %165, %168 : vector<17x32xf32>
    %170 = arith.addf %119, %169 : vector<17x32xf32>
    %c0_113 = arith.constant 0 : index
    %c0_114 = arith.constant 0 : index
    %171 = vector.load %arg23[%c0_113, %c0_114] : memref<17x32xf32, #tpu.memory_space<vmem>>, vector<17x32xf32>
    tpu.vector_store %arg23[%c0_113, %c0_114], %170 {strides = array<i32>} : memref<17x32xf32, #tpu.memory_space<vmem>>, vector<17x32xf32>,
    %c1_i32 = arith.constant 1 : i32
    %172 = arith.cmpi eq, %arg1, %c1_i32 : i32
    %173 = arith.extui %172 : i1 to i32
    %c0_i32_115 = arith.constant 0 : i32
    %174 = arith.cmpi ne, %173, %c0_i32_115 : i32
    scf.if %174 {
      %175 = vector.extract_strided_slice %170 {offsets = [0, 0], sizes = [1, 32], strides = [1, 1]} : vector<17x32xf32> to vector<1x32xf32>
      %c0_116 = arith.constant 0 : index
      %c0_117 = arith.constant 0 : index
      %176 = vector.load %arg19[%c0_116, %c0_117] : memref<1x32xf32, #tpu.memory_space<vmem>>, vector<1x32xf32>
      %c0_118 = arith.constant 0 : index
      %c0_119 = arith.constant 0 : index
      %177 = vector.load %arg20[%c0_118, %c0_119] : memref<1x32xf32, #tpu.memory_space<vmem>>, vector<1x32xf32>
      %cst_120 = arith.constant dense<0.000000e+00> : vector<1xf32>
      %178 = vector.multi_reduction <add>, %175, %cst_120 [1] : vector<1x32xf32> to vector<1xf32>
      %179 = vector.shape_cast %178 : vector<1xf32> to vector<1x1xf32>
      %cst_121 = arith.constant 3.200000e+01 : f32
      %180 = vector.broadcast %cst_121 : f32 to vector<1x1xf32>
      %181 = arith.divf %179, %180 : vector<1x1xf32>
      %182 = vector.broadcast %181 : vector<1x1xf32> to vector<1x32xf32>
      %183 = arith.subf %175, %182 : vector<1x32xf32>
      %184 = arith.mulf %183, %183 : vector<1x32xf32>
      %cst_122 = arith.constant dense<0.000000e+00> : vector<1xf32>
      %185 = vector.multi_reduction <add>, %184, %cst_122 [1] : vector<1x32xf32> to vector<1xf32>
      %186 = vector.shape_cast %185 : vector<1xf32> to vector<1x1xf32>
      %cst_123 = arith.constant 3.200000e+01 : f32
      %187 = vector.broadcast %cst_123 : f32 to vector<1x1xf32>
      %188 = arith.divf %186, %187 : vector<1x1xf32>
      %189 = vector.broadcast %181 : vector<1x1xf32> to vector<1x32xf32>
      %190 = arith.subf %175, %189 : vector<1x32xf32>
      %cst_124 = arith.constant 9.99999974E-6 : f32
      %191 = vector.broadcast %cst_124 : f32 to vector<1x1xf32>
      %192 = arith.addf %188, %191 : vector<1x1xf32>
      %193 = math.rsqrt %192 : vector<1x1xf32>
      %194 = vector.broadcast %193 : vector<1x1xf32> to vector<1x32xf32>
      %195 = arith.mulf %190, %194 : vector<1x32xf32>
      %196 = arith.mulf %195, %176 : vector<1x32xf32>
      %197 = arith.addf %196, %177 : vector<1x32xf32>
      %c0_125 = arith.constant 0 : index
      %c0_126 = arith.constant 0 : index
      %198 = vector.load %arg21[%c0_125, %c0_126] : memref<32x16xf32, #tpu.memory_space<vmem>>, vector<32x16xf32>
      %cst_127 = arith.constant dense<0.000000e+00> : vector<1x16xf32>
      %199 = tpu.matmul %197, %198, %cst_127 {dimension_numbers = #tpu.dot_dimension_numbers<[1], [0], [0], [1], [0, 0, 1, 1], [], []>} : vector<1x32xf32>, vector<32x16xf32>, vector<1x16xf32> -> vector<1x16xf32>
      %c0_128 = arith.constant 0 : index
      %c0_129 = arith.constant 0 : index
      %c0_130 = arith.constant 0 : index
      %200 = vector.load %arg22[%c0_128, %c0_129, %c0_130] : memref<1x1x16xf32, #tpu.memory_space<vmem>>, vector<1x1x16xf32>
      %201 = vector.shape_cast %200 : vector<1x1x16xf32> to vector<1x16xf32>
      %202 = vector.shape_cast %199 : vector<1x16xf32> to vector<1x1x16xf32>
      tpu.vector_store %arg22[%c0_128, %c0_129, %c0_130], %202 {strides = array<i32>} : memref<1x1x16xf32, #tpu.memory_space<vmem>>, vector<1x1x16xf32>,
    } else {
    }
    return
  }
  func.func @transform_0(%arg0: i32, %arg1: i32) -> (i32, i32, i32) {
    %c0_i32 = arith.constant 0 : i32
    %c0_i32_0 = arith.constant 0 : i32
    %c0_i32_1 = arith.constant 0 : i32
    return %arg0, %c0_i32, %c0_i32_0 : i32, i32, i32
  }
  func.func @transform_1(%arg0: i32, %arg1: i32) -> (i32, i32, i32) {
    %c0_i32 = arith.constant 0 : i32
    %c0_i32_0 = arith.constant 0 : i32
    %c0_i32_1 = arith.constant 0 : i32
    return %arg1, %c0_i32, %c0_i32_0 : i32, i32, i32
  }
  func.func @transform_2(%arg0: i32, %arg1: i32) -> (i32, i32, i32) {
    %c0_i32 = arith.constant 0 : i32
    %c0_i32_0 = arith.constant 0 : i32
    %c0_i32_1 = arith.constant 0 : i32
    return %arg1, %c0_i32, %c0_i32_0 : i32, i32, i32
  }
  func.func @transform_3(%arg0: i32, %arg1: i32) -> (i32, i32, i32, i32) {
    %c0_i32 = arith.constant 0 : i32
    %c0_i32_0 = arith.constant 0 : i32
    %c0_i32_1 = arith.constant 0 : i32
    %c0_i32_2 = arith.constant 0 : i32
    return %arg1, %c0_i32, %c0_i32_0, %c0_i32_1 : i32, i32, i32, i32
  }
  func.func @transform_4(%arg0: i32, %arg1: i32) -> (i32, i32, i32, i32) {
    %c0_i32 = arith.constant 0 : i32
    %c0_i32_0 = arith.constant 0 : i32
    %c0_i32_1 = arith.constant 0 : i32
    %c0_i32_2 = arith.constant 0 : i32
    return %arg1, %c0_i32, %c0_i32_0, %c0_i32_1 : i32, i32, i32, i32
  }
  func.func @transform_5(%arg0: i32, %arg1: i32) -> (i32, i32, i32, i32) {
    %c0_i32 = arith.constant 0 : i32
    %c0_i32_0 = arith.constant 0 : i32
    %c0_i32_1 = arith.constant 0 : i32
    %c0_i32_2 = arith.constant 0 : i32
    return %arg1, %c0_i32, %c0_i32_0, %c0_i32_1 : i32, i32, i32, i32
  }
  func.func @transform_6(%arg0: i32, %arg1: i32) -> (i32, i32, i32, i32) {
    %c0_i32 = arith.constant 0 : i32
    %c0_i32_0 = arith.constant 0 : i32
    %c0_i32_1 = arith.constant 0 : i32
    %c0_i32_2 = arith.constant 0 : i32
    return %arg1, %c0_i32, %c0_i32_0, %c0_i32_1 : i32, i32, i32, i32
  }
  func.func @transform_7(%arg0: i32, %arg1: i32) -> (i32, i32, i32, i32) {
    %c0_i32 = arith.constant 0 : i32
    %c0_i32_0 = arith.constant 0 : i32
    %c0_i32_1 = arith.constant 0 : i32
    %c0_i32_2 = arith.constant 0 : i32
    return %arg1, %c0_i32, %c0_i32_0, %c0_i32_1 : i32, i32, i32, i32
  }
  func.func @transform_8(%arg0: i32, %arg1: i32) -> (i32, i32, i32, i32) {
    %c0_i32 = arith.constant 0 : i32
    %c0_i32_0 = arith.constant 0 : i32
    %c0_i32_1 = arith.constant 0 : i32
    %c0_i32_2 = arith.constant 0 : i32
    return %arg1, %c0_i32, %c0_i32_0, %c0_i32_1 : i32, i32, i32, i32
  }
  func.func @transform_9(%arg0: i32, %arg1: i32) -> (i32, i32, i32, i32) {
    %c0_i32 = arith.constant 0 : i32
    %c0_i32_0 = arith.constant 0 : i32
    %c0_i32_1 = arith.constant 0 : i32
    %c0_i32_2 = arith.constant 0 : i32
    return %arg1, %c0_i32, %c0_i32_0, %c0_i32_1 : i32, i32, i32, i32
  }
  func.func @transform_10(%arg0: i32, %arg1: i32) -> (i32, i32, i32) {
    %c0_i32 = arith.constant 0 : i32
    %c0_i32_0 = arith.constant 0 : i32
    %c0_i32_1 = arith.constant 0 : i32
    return %arg1, %c0_i32, %c0_i32_0 : i32, i32, i32
  }
  func.func @transform_11(%arg0: i32, %arg1: i32) -> (i32, i32, i32) {
    %c0_i32 = arith.constant 0 : i32
    %c0_i32_0 = arith.constant 0 : i32
    %c0_i32_1 = arith.constant 0 : i32
    return %arg1, %c0_i32, %c0_i32_0 : i32, i32, i32
  }
  func.func @transform_12(%arg0: i32, %arg1: i32) -> (i32, i32, i32) {
    %c0_i32 = arith.constant 0 : i32
    %c0_i32_0 = arith.constant 0 : i32
    %c0_i32_1 = arith.constant 0 : i32
    return %arg1, %c0_i32, %c0_i32_0 : i32, i32, i32
  }
  func.func @transform_13(%arg0: i32, %arg1: i32) -> (i32, i32, i32) {
    %c0_i32 = arith.constant 0 : i32
    %c0_i32_0 = arith.constant 0 : i32
    %c0_i32_1 = arith.constant 0 : i32
    return %arg1, %c0_i32, %c0_i32_0 : i32, i32, i32
  }
  func.func @transform_14(%arg0: i32, %arg1: i32) -> (i32, i32, i32) {
    %c0_i32 = arith.constant 0 : i32
    %c0_i32_0 = arith.constant 0 : i32
    %c0_i32_1 = arith.constant 0 : i32
    return %arg1, %c0_i32, %c0_i32_0 : i32, i32, i32
  }
  func.func @transform_15(%arg0: i32, %arg1: i32) -> (i32, i32, i32) {
    %c0_i32 = arith.constant 0 : i32
    %c0_i32_0 = arith.constant 0 : i32
    %c0_i32_1 = arith.constant 0 : i32
    return %arg1, %c0_i32, %c0_i32_0 : i32, i32, i32
  }
  func.func @transform_16(%arg0: i32, %arg1: i32) -> (i32, i32, i32) {
    %c0_i32 = arith.constant 0 : i32
    %c0_i32_0 = arith.constant 0 : i32
    %c0_i32_1 = arith.constant 0 : i32
    return %arg1, %c0_i32, %c0_i32_0 : i32, i32, i32
  }
  func.func @transform_17(%arg0: i32, %arg1: i32) -> (i32, i32) {
    %c0_i32 = arith.constant 0 : i32
    %c0_i32_0 = arith.constant 0 : i32
    %c0_i32_1 = arith.constant 0 : i32
    return %c0_i32, %c0_i32_0 : i32, i32
  }
  func.func @transform_18(%arg0: i32, %arg1: i32) -> (i32, i32) {
    %c0_i32 = arith.constant 0 : i32
    %c0_i32_0 = arith.constant 0 : i32
    %c0_i32_1 = arith.constant 0 : i32
    return %c0_i32, %c0_i32_0 : i32, i32
  }
  func.func @transform_19(%arg0: i32, %arg1: i32) -> (i32, i32) {
    %c0_i32 = arith.constant 0 : i32
    %c0_i32_0 = arith.constant 0 : i32
    %c0_i32_1 = arith.constant 0 : i32
    return %c0_i32, %c0_i32_0 : i32, i32
  }
  func.func @transform_20(%arg0: i32, %arg1: i32) -> (i32, i32, i32) {
    %c0_i32 = arith.constant 0 : i32
    %c0_i32_0 = arith.constant 0 : i32
    %c0_i32_1 = arith.constant 0 : i32
    return %arg0, %c0_i32, %c0_i32_0 : i32, i32, i32
  }
}

module attributes {stable_mosaic.version = 11 : i64} {
  func.func @_embed_kernel(%arg0: i32, %arg1: memref<1x16x48xbf16, #tpu.memory_space<vmem>>, %arg2: memref<48x32xbf16, #tpu.memory_space<vmem>>, %arg3: memref<1x32xf32, #tpu.memory_space<vmem>>, %arg4: memref<17x32xf32, #tpu.memory_space<vmem>>, %arg5: memref<1x32xf32, #tpu.memory_space<vmem>>, %arg6: memref<1x32xf32, #tpu.memory_space<vmem>>, %arg7: memref<1x17x32xbf16, #tpu.memory_space<vmem>>) attributes {dimension_semantics = [#tpu.dimension_semantics<parallel>], iteration_bounds = array<i64: 2>, scalar_prefetch = 0 : i64, scratch_operands = 0 : i64, tpu.core_type = #tpu.core_type<tc>, window_params = [{transform_indices = @transform_0, window_bounds = array<i64: 1, 16, 48>}, {pipeline_mode = #tpu.pipeline_mode<synchronous>, transform_indices = @transform_1, window_bounds = array<i64: 48, 32>}, {pipeline_mode = #tpu.pipeline_mode<synchronous>, transform_indices = @transform_2, window_bounds = array<i64: 1, 32>}, {pipeline_mode = #tpu.pipeline_mode<synchronous>, transform_indices = @transform_3, window_bounds = array<i64: 17, 32>}, {pipeline_mode = #tpu.pipeline_mode<synchronous>, transform_indices = @transform_4, window_bounds = array<i64: 1, 32>}, {pipeline_mode = #tpu.pipeline_mode<synchronous>, transform_indices = @transform_5, window_bounds = array<i64: 1, 32>}, {transform_indices = @transform_6, window_bounds = array<i64: 1, 17, 32>}]} {
    %c0 = arith.constant 0 : index
    %c0_0 = arith.constant 0 : index
    %0 = vector.load %arg5[%c0, %c0_0] : memref<1x32xf32, #tpu.memory_space<vmem>>, vector<1x32xf32>
    %c0_1 = arith.constant 0 : index
    %c0_2 = arith.constant 0 : index
    %1 = vector.load %arg6[%c0_1, %c0_2] : memref<1x32xf32, #tpu.memory_space<vmem>>, vector<1x32xf32>
    %c0_3 = arith.constant 0 : index
    %c0_4 = arith.constant 0 : index
    %2 = vector.load %arg4[%c0_3, %c0_4] : memref<17x32xf32, #tpu.memory_space<vmem>>, vector<17x32xf32>
    %c0_5 = arith.constant 0 : index
    %c0_6 = arith.constant 0 : index
    %3 = vector.load %arg3[%c0_5, %c0_6] : memref<1x32xf32, #tpu.memory_space<vmem>>, vector<1x32xf32>
    %4 = vector.extract_strided_slice %2 {offsets = [0, 0], sizes = [1, 32], strides = [1, 1]} : vector<17x32xf32> to vector<1x32xf32>
    %5 = arith.addf %3, %4 : vector<1x32xf32>
    %cst = arith.constant dense<0.000000e+00> : vector<1xf32>
    %6 = vector.multi_reduction <add>, %5, %cst [1] : vector<1x32xf32> to vector<1xf32>
    %7 = vector.shape_cast %6 : vector<1xf32> to vector<1x1xf32>
    %cst_7 = arith.constant 3.200000e+01 : f32
    %8 = vector.broadcast %cst_7 : f32 to vector<1x1xf32>
    %9 = arith.divf %7, %8 : vector<1x1xf32>
    %10 = vector.broadcast %9 : vector<1x1xf32> to vector<1x32xf32>
    %11 = arith.subf %5, %10 : vector<1x32xf32>
    %12 = arith.mulf %11, %11 : vector<1x32xf32>
    %cst_8 = arith.constant dense<0.000000e+00> : vector<1xf32>
    %13 = vector.multi_reduction <add>, %12, %cst_8 [1] : vector<1x32xf32> to vector<1xf32>
    %14 = vector.shape_cast %13 : vector<1xf32> to vector<1x1xf32>
    %cst_9 = arith.constant 3.200000e+01 : f32
    %15 = vector.broadcast %cst_9 : f32 to vector<1x1xf32>
    %16 = arith.divf %14, %15 : vector<1x1xf32>
    %17 = vector.broadcast %9 : vector<1x1xf32> to vector<1x32xf32>
    %18 = arith.subf %5, %17 : vector<1x32xf32>
    %cst_10 = arith.constant 9.99999974E-6 : f32
    %19 = vector.broadcast %cst_10 : f32 to vector<1x1xf32>
    %20 = arith.addf %16, %19 : vector<1x1xf32>
    %21 = math.rsqrt %20 : vector<1x1xf32>
    %22 = vector.broadcast %21 : vector<1x1xf32> to vector<1x32xf32>
    %23 = arith.mulf %18, %22 : vector<1x32xf32>
    %24 = arith.mulf %23, %0 : vector<1x32xf32>
    %25 = arith.addf %24, %1 : vector<1x32xf32>
    %26 = arith.truncf %25 : vector<1x32xf32> to vector<1x32xbf16>
    %c0_11 = arith.constant 0 : index
    %c0_12 = arith.constant 0 : index
    %c0_13 = arith.constant 0 : index
    %27 = vector.load %arg7[%c0_11, %c0_12, %c0_13] : memref<1x17x32xbf16, #tpu.memory_space<vmem>>, vector<1x1x32xbf16>
    %28 = vector.shape_cast %27 : vector<1x1x32xbf16> to vector<1x32xbf16>
    %29 = vector.shape_cast %26 : vector<1x32xbf16> to vector<1x1x32xbf16>
    tpu.vector_store %arg7[%c0_11, %c0_12, %c0_13], %29 {strides = array<i32>} : memref<1x17x32xbf16, #tpu.memory_space<vmem>>, vector<1x1x32xbf16>,
    %c0_14 = arith.constant 0 : index
    %c0_15 = arith.constant 0 : index
    %c0_16 = arith.constant 0 : index
    %30 = vector.load %arg1[%c0_14, %c0_15, %c0_16] : memref<1x16x48xbf16, #tpu.memory_space<vmem>>, vector<1x16x48xbf16>
    %31 = vector.shape_cast %30 : vector<1x16x48xbf16> to vector<16x48xbf16>
    %c0_17 = arith.constant 0 : index
    %c0_18 = arith.constant 0 : index
    %32 = vector.load %arg2[%c0_17, %c0_18] : memref<48x32xbf16, #tpu.memory_space<vmem>>, vector<48x32xbf16>
    %cst_19 = arith.constant dense<0.000000e+00> : vector<16x32xf32>
    %33 = tpu.matmul %31, %32, %cst_19 {dimension_numbers = #tpu.dot_dimension_numbers<[1], [0], [0], [1], [0, 0, 1, 1], [], []>} : vector<16x48xbf16>, vector<48x32xbf16>, vector<16x32xf32> -> vector<16x32xf32>
    %34 = vector.extract_strided_slice %2 {offsets = [1, 0], sizes = [16, 32], strides = [1, 1]} : vector<17x32xf32> to vector<16x32xf32>
    %35 = arith.addf %33, %34 : vector<16x32xf32>
    %cst_20 = arith.constant dense<0.000000e+00> : vector<16xf32>
    %36 = vector.multi_reduction <add>, %35, %cst_20 [1] : vector<16x32xf32> to vector<16xf32>
    %37 = vector.shape_cast %36 : vector<16xf32> to vector<16x1xf32>
    %cst_21 = arith.constant 3.200000e+01 : f32
    %38 = vector.broadcast %cst_21 : f32 to vector<16x1xf32>
    %39 = arith.divf %37, %38 : vector<16x1xf32>
    %40 = vector.broadcast %39 : vector<16x1xf32> to vector<16x32xf32>
    %41 = arith.subf %35, %40 : vector<16x32xf32>
    %42 = arith.mulf %41, %41 : vector<16x32xf32>
    %cst_22 = arith.constant dense<0.000000e+00> : vector<16xf32>
    %43 = vector.multi_reduction <add>, %42, %cst_22 [1] : vector<16x32xf32> to vector<16xf32>
    %44 = vector.shape_cast %43 : vector<16xf32> to vector<16x1xf32>
    %cst_23 = arith.constant 3.200000e+01 : f32
    %45 = vector.broadcast %cst_23 : f32 to vector<16x1xf32>
    %46 = arith.divf %44, %45 : vector<16x1xf32>
    %47 = vector.broadcast %39 : vector<16x1xf32> to vector<16x32xf32>
    %48 = arith.subf %35, %47 : vector<16x32xf32>
    %cst_24 = arith.constant 9.99999974E-6 : f32
    %49 = vector.broadcast %cst_24 : f32 to vector<16x1xf32>
    %50 = arith.addf %46, %49 : vector<16x1xf32>
    %51 = math.rsqrt %50 : vector<16x1xf32>
    %52 = vector.broadcast %51 : vector<16x1xf32> to vector<16x32xf32>
    %53 = arith.mulf %48, %52 : vector<16x32xf32>
    %54 = vector.broadcast %0 : vector<1x32xf32> to vector<16x32xf32>
    %55 = arith.mulf %53, %54 : vector<16x32xf32>
    %56 = vector.broadcast %1 : vector<1x32xf32> to vector<16x32xf32>
    %57 = arith.addf %55, %56 : vector<16x32xf32>
    %58 = arith.truncf %57 : vector<16x32xf32> to vector<16x32xbf16>
    %c0_25 = arith.constant 0 : index
    %c1 = arith.constant 1 : index
    %c0_26 = arith.constant 0 : index
    %59 = vector.load %arg7[%c0_25, %c1, %c0_26] : memref<1x17x32xbf16, #tpu.memory_space<vmem>>, vector<1x16x32xbf16>
    %60 = vector.shape_cast %59 : vector<1x16x32xbf16> to vector<16x32xbf16>
    %61 = vector.shape_cast %58 : vector<16x32xbf16> to vector<1x16x32xbf16>
    tpu.vector_store %arg7[%c0_25, %c1, %c0_26], %61 {strides = array<i32>} : memref<1x17x32xbf16, #tpu.memory_space<vmem>>, vector<1x16x32xbf16>,
    return
  }
  func.func @transform_0(%arg0: i32) -> (i32, i32, i32) {
    %c0_i32 = arith.constant 0 : i32
    %c0_i32_0 = arith.constant 0 : i32
    %c0_i32_1 = arith.constant 0 : i32
    return %arg0, %c0_i32, %c0_i32_0 : i32, i32, i32
  }
  func.func @transform_1(%arg0: i32) -> (i32, i32) {
    %c0_i32 = arith.constant 0 : i32
    %c0_i32_0 = arith.constant 0 : i32
    %c0_i32_1 = arith.constant 0 : i32
    return %c0_i32, %c0_i32_0 : i32, i32
  }
  func.func @transform_2(%arg0: i32) -> (i32, i32) {
    %c0_i32 = arith.constant 0 : i32
    %c0_i32_0 = arith.constant 0 : i32
    %c0_i32_1 = arith.constant 0 : i32
    return %c0_i32, %c0_i32_0 : i32, i32
  }
  func.func @transform_3(%arg0: i32) -> (i32, i32) {
    %c0_i32 = arith.constant 0 : i32
    %c0_i32_0 = arith.constant 0 : i32
    %c0_i32_1 = arith.constant 0 : i32
    return %c0_i32, %c0_i32_0 : i32, i32
  }
  func.func @transform_4(%arg0: i32) -> (i32, i32) {
    %c0_i32 = arith.constant 0 : i32
    %c0_i32_0 = arith.constant 0 : i32
    %c0_i32_1 = arith.constant 0 : i32
    return %c0_i32, %c0_i32_0 : i32, i32
  }
  func.func @transform_5(%arg0: i32) -> (i32, i32) {
    %c0_i32 = arith.constant 0 : i32
    %c0_i32_0 = arith.constant 0 : i32
    %c0_i32_1 = arith.constant 0 : i32
    return %c0_i32, %c0_i32_0 : i32, i32
  }
  func.func @transform_6(%arg0: i32) -> (i32, i32, i32) {
    %c0_i32 = arith.constant 0 : i32
    %c0_i32_0 = arith.constant 0 : i32
    %c0_i32_1 = arith.constant 0 : i32
    return %arg0, %c0_i32, %c0_i32_0 : i32, i32, i32
  }
}

</mosaic_0001>

<bundles_post_ra>
// kernel: encode_image.2
= control target key start
LH: loop header
LB: loop body
LE: loop exit
PB: predicated region body
PF: predicated region fallthrough
CT: control target
= control target key end

     0   :  { %s608_s21 = smov 0   ;;  %s684_s0 = inlined_call_operand.vmem [shape: bf16[2,16,48], index: 0, kind: input, shape index: {}]   ;;  %s685_s1 = inlined_call_operand.vmem [shape: bf16[48,32], index: 1, kind: input, shape index: {}]   ;;  %s686_s2 = inlined_call_operand.vmem [shape: f32[1,32], index: 2, kind: input, shape index: {}]   ;;  %s687_s3 = inlined_call_operand.vmem [shape: f32[17,32], index: 3, kind: input, shape index: {}]   ;;  %s688_s4 = inlined_call_operand.vmem [shape: f32[1,32], index: 4, kind: input, shape index: {}]   ;;  %s689_s5 = inlined_call_operand.vmem [shape: f32[1,32], index: 5, kind: input, shape index: {}]   ;;  %s690_s6 = inlined_call_operand.vmem [shape: bf16[2,17,32], index: 6, kind: output, shape index: {}]  }
   0x1 LB: > { %s508_s22 = sadd.s32 4294967295, %s569_s21   ;;  %p512_p0 = scmp.ge.s32.totalorder %s569_s21, 1  ;;  %s569_s21 = sphi %s608_s21, %s16_s21  }
   0x2   : > { %p212_p1 = scmp.lt.s32.totalorder %s569_s21, 3 }
   0x4   : > { %p213_p2 = pnand %p512_p0, %p212_p1 }
   0x5   : > { %v553_v0 = vld [vmem:[%s685_s1] sm:$0xff] (!%p213_p2)   ;;  %v571_v1 = vmov (!%p213_p2), 0.0   ;;  %v554_v2 = vld [vmem:[%s685_s1 + $0x8] sm:$0xff] (!%p213_p2)   ;;  %vm572_vm0 = vmmov (!%p213_p2), 0   ;;  %p242_p3 = scmp.lt.s32.totalorder (!%p213_p2), %s508_s22, 1  ;;  %vm260_vm1 = vcmask (!%p213_p2), 253952   ;;  %v399_v54 = vlaneseq (!%p213_p2) }
   0x6   : > { %216 = sbr.rel (%p213_p2) target bundleno = 557 (0x22d), region = 44  ;;  %532 = vmatprep.subr.bf16.mxu0 (!%p213_p2), %v571_v1  ;;  %538 = vmatprep.mubr.msk.bf16.mxu0 (!%p213_p2), %vm572_vm0, %v571_v1  ;;  %v255_v3 = vld [vmem:[%s687_s3] sm:$0xff] (!%p213_p2)  ;;  %v555_v6 = vld [vmem:[%s685_s1 + $0x10] sm:$0xff] (!%p213_p2)   ;;  %vm326_vm2 = vcmask (!%p213_p2), 392192   ;;  %v256_v9 = vld [vmem:[%s687_s3 + $0x8] sm:$0xff] (!%p213_p2)  ;;  %vm318_vm3 = vcmask (!%p213_p2), 1046528  }
   0x7   : > { %533 = vmatpush3.bf16.msra.mxu0 (!%p213_p2), %v553_v0  ;;  %v258_v4 = vld [vmem:[%s686_s2] sm:$0x1] (!%p213_p2)  ;;  %v257_v11 = vld [vmem:[%s687_s3 + $0x10] sm:$0x1] (!%p213_p2)  ;;  %v319_v12 = vrot.slane (!%p213_p2), %v255_v3, 1  ;;  %v320_v13 = vrot.slane (!%p213_p2), %v256_v9, 1 }
   0x8   : > { %534 = vmatprep.subr.bf16.mxu0 (!%p213_p2), %v571_v1  ;;  %v259_v5 = vadd.f32 (!%p213_p2), %v258_v4, %v255_v3  ;;  %v322_v15 = vrot.slane (!%p213_p2), %v257_v11, 1  ;;  %vm371_vm4 = vcmask (!%p213_p2), 261120   ;;  %v253_v43 = vld [vmem:[%s688_s4] sm:$0x1] (!%p213_p2)  ;;  %vm279_vm5 = vsmask.f32 (!%p213_p2), 256 }
   0x9   : > { %v321_v16 = vsel (!%p213_p2), %vm318_vm3, %v319_v12, %v320_v13  ;;  %v254_v45 = vld [vmem:[%s689_s5] sm:$0x1] (!%p213_p2)  ;;  %vm663_vm6 = vmand (!%p213_p2), %vm260_vm1, %vm279_vm5  ;;  %v400_v59 = vshrl.u32 (!%p213_p2), %v399_v54, 7  ;;  %vm442_vm7 = vcmask (!%p213_p2), 257024   ;;  %vm443_vm8 = vsmask.f32 (!%p213_p2), 7938 }
   0xa   : > { %v261_v7 = vsel (!%p213_p2), %vm260_vm1, %v259_v5, 0.0  ;;  %v323_v19 = vsel (!%p213_p2), %vm318_vm3, %v320_v13, %v322_v15  ;;  %vm420_vm9 = vsmask.f32 (!%p213_p2), 4368  ;;  %vm444_vm10 = vmand (!%p213_p2), %vm442_vm7, %vm443_vm8 }
   0xb   : > { %535 = vmatpush3.bf16.msra.mxu0 (!%p213_p2), %v554_v2  ;;  %262 = vadd.xlane.f32.xlu0 (!%p213_p2), %v261_v7  ;;  %v401_v60 = vsub.s32 (!%p213_p2), 0, %v400_v59  ;;  %vm421_vm11 = vmor (!%p213_p2), %vm279_vm5, %vm420_vm9 }
   0xc   : > { %536 = vmatprep.subr.bf16.mxu0 (!%p213_p2), %v571_v1 }
   0xd   : > { %s694_s22 = smov (!%p242_p3, %s508_s22), 1  ;;  %v402_v61 = vrot.slane %v253_v43, %v401_v60  ;;  %v410_v63 = vrot.slane %v254_v45, %v401_v60 }
   0xe   : > { %s525_s9 = sshll.u32 %s694_s22, 3  ;;  %s542_s17 = smul.u32 12, %s694_s22 }
   0xf   : > { %s246_s12 = scalar_lea.vmem %s684_s0, %s525_s9  ;;  %537 = vmatpush3.bf16.msra.mxu0 %v555_v6 }
  0x10   : > { %v556_v8 = vld [vmem:[%s246_s12] sm:$0xff]   ;;  %s659_s26 = scalar_lea.vmem %s690_s6, %s542_s17 }
  0x11   : > { %v281_v49 = vld [vmem:[%s659_s26] sm:$0x1] }
  0x12   : > { %539 = vmatmul.mubr.msk.bf16.vlgmr.msra.gmra.mrb[0].mxu0 %vm326_vm2, %v556_v8 }
  0x98   : > { %v263_v10 = vpop.xlane.xlu0 %262 }
  0x99   : > { %v265_v14 = vmul.f32 0.03125, %v263_v10 }
  0x9b   : > { %v266_v17 = vsub.f32 %v259_v5, %v265_v14 }
  0x9d   : > { %v267_v26 = vmul.f32 %v266_v17, %v266_v17 }
  0x9f   : > { %v268_v28 = vsel %vm260_vm1, %v267_v26, 0.0 }
  0xe5   : > { %v364_v18 = vpop.f32.mrb[0].mxu0 }
  0xe6   : > { %v365_v20 = vadd.f32 %v364_v18, %v321_v16  ;;  %v540_v21 = vpop.f32.mrb[1].mxu0  ;;  %v450_v16 = vld [vmem:[%s659_s26 + $0x8] sm:$0x1] }
  0xe7   : > { %v367_v22 = vpop.f32.mrb[2].mxu0 }
  0xe8   : > { %v368_v23 = vadd.f32 %v367_v22, %v323_v19  ;;  %v541_v24 = vpop.f32.mrb[3].mxu0  ;;  %v372_v25 = vsel %vm371_vm4, %v365_v20, 0.0 }
  0xe9   : > { %373 = vadd.xlane.f32.xlu0 %v372_v25 }
  0xea   : > { %v375_v27 = vsel %vm371_vm4, %v368_v23, 0.0 }
  0xeb   : > { %376 = vadd.xlane.f32.xlu1 %v375_v27 }
  0xef   : > { %269 = vadd.xlane.f32.xlu1 %v268_v28 }
 0x176   : > { %v374_v29 = vpop.xlane.xlu0 %373 }
 0x177   : > { %v378_v30 = vmul.f32 0.03125, %v374_v29 }
 0x178   : > { %v377_v31 = vpop.xlane.xlu1 %376 }
 0x179   : > { %v380_v32 = vsub.f32 %v365_v20, %v378_v30  ;;  %v379_v33 = vmul.f32 0.03125, %v377_v31 }
 0x17b   : > { %v381_v34 = vsub.f32 %v368_v23, %v379_v33  ;;  %v382_v35 = vmul.f32 %v380_v32, %v380_v32 }
 0x17c   : > { %v270_v36 = vpop.xlane.xlu1 %269 }
 0x17d   : > { %v271_v37 = vmul.f32 0.03125, %v270_v36  ;;  %v384_v38 = vsel %vm371_vm4, %v382_v35, 0.0  ;;  %v383_v39 = vmul.f32 %v381_v34, %v381_v34 }
 0x17e   : > { %385 = vadd.xlane.f32.xlu0 %v384_v38 }
 0x17f   : > { %v272_v40 = vadd.f32 1e-05, %v271_v37  ;;  %v387_v41 = vsel %vm371_vm4, %v383_v39, 0.0 }
 0x180   : > { %388 = vadd.xlane.f32.xlu1 %v387_v41 }
 0x181   : > { %557 = vrsqrt.f32 %v272_v40 }
 0x18b   : > { %v558_v42 = vpop.eup %557 }
 0x18c   : > { %v274_v44 = vmul.f32 %v558_v42, %v266_v17 }
 0x18e   : > { %v275_v46 = vmul.f32 %v274_v44, %v253_v43 }
 0x190   : > { %v276_v47 = vadd.f32 %v275_v46, %v254_v45 }
 0x192   : > { %v277_v50 = vpack.c.bf16 %v276_v47, %v276_v47 }
 0x194   : > { %v282_v51 = vsel %vm663_vm6, %v277_v50, %v281_v49 }
 0x195   : > { %283 = vst [vmem:[%s659_s26] sm:$0x1] %v282_v51 }
 0x19c   : > { %v445_v17 = vld [vmem:[%s659_s26] sm:$0xf] }
 0x20b   : > { %v386_v52 = vpop.xlane.xlu0 %385 }
 0x20c   : > { %v390_v53 = vmul.f32 0.03125, %v386_v52 }
 0x20d   : > { %v389_v55 = vpop.xlane.xlu1 %388 }
 0x20e   : > { %v392_v56 = vadd.f32 1e-05, %v390_v53  ;;  %v391_v57 = vmul.f32 0.03125, %v389_v55 }
 0x210   : > { %559 = vrsqrt.f32 %v392_v56  ;;  %v393_v58 = vadd.f32 1e-05, %v391_v57 }
 0x212   : > { %561 = vrsqrt.f32 %v393_v58 }
 0x21a   : > { %v560_v62 = vpop.eup %559 }
 0x21b   : > { %v396_v0 = vmul.f32 %v560_v62, %v380_v32 }
 0x21c   : > { %v562_v1 = vpop.eup %561 }
 0x21d   : > { %v404_v2 = vmul.f32 %v402_v61, %v396_v0  ;;  %v397_v3 = vmul.f32 %v562_v1, %v381_v34 }
 0x21f   : > { %v412_v4 = vadd.f32 %v410_v63, %v404_v2  ;;  %v405_v5 = vmul.f32 %v402_v61, %v397_v3 }
 0x221   : > { %v526_v6 = vpack.c.bf16 %v412_v4, %v412_v4  ;;  %v413_v7 = vadd.f32 %v410_v63, %v405_v5 }
 0x223   : > { %v423_v8 = vshrl.u32 %v526_v6, 16  ;;  %v527_v9 = vpack.c.bf16 %v413_v7, %v413_v7  ;;  %v426_v11 = vshll.u32 %v526_v6, 16 }
 0x225   : > { %v425_v10 = vrot.slane %v423_v8, 7  ;;  %v431_v12 = vshrl.u32 %v527_v9, 16  ;;  %v434_v15 = vshll.u32 %v527_v9, 16 }
 0x227   : > { %v428_v13 = vor.u32 %v426_v11, %v425_v10  ;;  %v433_v14 = vrot.slane %v431_v12, 7  ;;  %v429_v18 = vrot.slane %v425_v10, 4 }
 0x229   : > { %v446_v19 = vsel %vm444_vm10, %v428_v13, %v445_v17  ;;  %v436_v20 = vor.u32 %v434_v15, %v433_v14  ;;  %v438_v21 = vrot.slane %v433_v14, 4 }
 0x22a   : > { %447 = vst [vmem:[%s659_s26] sm:$0xf] %v446_v19 }
 0x22b   : > { %v437_v22 = vsel %vm421_vm11, %v429_v18, %v436_v20  ;;  %v451_v23 = vsel %vm663_vm6, %v438_v21, %v450_v16 }
 0x22c   : > { %449 = vst.msk [vmem:[%s659_s26 + $0x4] sm:$0xf] %vm442_vm7, %v437_v22  ;;  %452 = vst [vmem:[%s659_s26 + $0x8] sm:$0x1] %v451_v23 }
 0x22d PF: > { %s16_s21 = sadd.s32 1, %s569_s21  }
 0x22e   : > { %p13_p4 = scmp.ge.s32.totalorder %s16_s21, 4  }
 0x230   :  { %15 = sbr.rel (!%p13_p4) target bundleno = 1 (0x1), region = 74 }

// kernel: encode_image.3
= control target key start
LH: loop header
LB: loop body
LE: loop exit
PB: predicated region body
PF: predicated region fallthrough
CT: control target
= control target key end

     0   :  { %s3649_s0 = inlined_call_operand.vmem [shape: bf16[2,17,32], index: 0, kind: input, shape index: {}]   ;;  %s3650_s1 = inlined_call_operand.vmem [shape: f32[2,1,32], index: 1, kind: input, shape index: {}, may-alias: {1,11}]   ;;  %s3651_s2 = inlined_call_operand.vmem [shape: f32[2,1,32], index: 2, kind: input, shape index: {}, may-alias: {2,10,12,16}]   ;;  %s3652_s3 = inlined_call_operand.vmem [shape: bf16[2,2,32,16], index: 3, kind: input, shape index: {}]   ;;  %s3653_s4 = inlined_call_operand.vmem [shape: bf16[2,2,32,16], index: 4, kind: input, shape index: {}]   ;;  %s3654_s5 = inlined_call_operand.vmem [shape: bf16[2,2,32,16], index: 5, kind: input, shape index: {}]   ;;  %s3655_s6 = inlined_call_operand.vmem [shape: f32[2,2,1,16], index: 6, kind: input, shape index: {}, may-alias: {6,7,8}]   ;;  %s3656_s7 = inlined_call_operand.vmem [shape: f32[2,2,1,16], index: 7, kind: input, shape index: {}, may-alias: {6,7,8}]   ;;  %s3657_s8 = inlined_call_operand.vmem [shape: f32[2,2,1,16], index: 8, kind: input, shape index: {}, may-alias: {6,7,8}]   ;;  %s3658_s9 = inlined_call_operand.vmem [shape: bf16[2,2,16,32], index: 9, kind: input, shape index: {}]   ;;  %s3659_s10 = inlined_call_operand.vmem [shape: f32[2,1,32], index: 10, kind: input, shape index: {}, may-alias: {2,10,12,16}]   ;;  %s3660_s11 = inlined_call_operand.vmem [shape: f32[2,1,32], index: 11, kind: input, shape index: {}, may-alias: {1,11}]   ;;  %s3661_s12 = inlined_call_operand.vmem [shape: f32[2,1,32], index: 12, kind: input, shape index: {}, may-alias: {2,10,12,16}]   ;;  %s3662_s13 = inlined_call_operand.vmem [shape: bf16[2,32,128], index: 13, kind: input, shape index: {}]   ;;  %s3663_s14 = inlined_call_operand.vmem [shape: f32[2,1,128], index: 14, kind: input, shape index: {}]   ;;  %s3664_s15 = inlined_call_operand.vmem [shape: bf16[2,128,32], index: 15, kind: input, shape index: {}]   ;;  %s3665_s16 = inlined_call_operand.vmem [shape: f32[2,1,32], index: 16, kind: input, shape index: {}, may-alias: {2,10,12,16}]   ;;  %s3666_s17 = inlined_call_operand.vmem [shape: f32[1,32], index: 17, kind: input, shape index: {}]   ;;  %s3667_s18 = inlined_call_operand.vmem [shape: f32[1,32], index: 18, kind: input, shape index: {}]   ;;  %s3668_s19 = inlined_call_operand.vmem [shape: f32[32,16], index: 19, kind: input, shape index: {}]   ;;  %s3669_s20 = inlined_call_operand.hbm [shape: f32[2,1,16], index: 20, kind: output, shape index: {}]  }
   0x1   :  { %3686 = sst [smem:[#allocation20_spill]] %s3649_s0 }
   0x2   :  { %3687 = sst [smem:[#allocation21_spill]] %s3650_s1 }
   0x3   :  { %3688 = sst [smem:[#allocation22_spill]] %s3651_s2 }
   0x4   :  { %3689 = sst [smem:[#allocation23_spill]] %s3652_s3 }
   0x5   :  { %3690 = sst [smem:[#allocation24_spill]] %s3653_s4 }
   0x6   :  { %3691 = sst [smem:[#allocation25_spill]] %s3654_s5 }
   0x7   :  { %3692 = sst [smem:[#allocation26_spill]] %s3655_s6 }
   0x8   :  { %3693 = sst [smem:[#allocation27_spill]] %s3656_s7 }
   0x9   :  { %3694 = sst [smem:[#allocation28_spill]] %s3657_s8 }
   0xa   :  { %3695 = sst [smem:[#allocation29_spill]] %s3658_s9 }
   0xb   :  { %3696 = sst [smem:[#allocation30_spill]] %s3660_s11 }
   0xc   :  { %3697 = sst [smem:[#allocation31_spill]] %s3664_s15 }
   0xd   :  { %3698 = sst [smem:[#allocation32_spill]] %s3666_s17 }
   0xe   :  { %3699 = sst [smem:[#allocation33_spill]] %s3667_s18 }
   0xf   :  { %3700 = sst [smem:[#allocation34_spill]] %s3668_s19 }
  0x10   :  { %3701 = sst [smem:[#allocation35_spill]] %s3669_s20 }
  0x11   :  { %25 = vsyncpa [#allocation4], 0 }
  0x12   :  { %27 = vsyncpa [#allocation4 + $0x1], 0  ;;  %s3217_s1 = smov 0   ;;  %s3219_s22 = smov 0  }
  0x13   :  { %s3221_s23 = smov 0   ;;  %s3223_s24 = smov 0  }
  0x14   :  { %s3225_s2 = smov 0   ;;  %s3227_s25 = smov 0  }
  0x15   :  { %s3229_s3 = smov 0   ;;  %s3231_s26 = smov 0  }
  0x16 LB: > { %3702 = sst [smem:[#allocation6_spill]] %s3077_s1  ;;  %s2535_s27 = sadd.s32 4294967295, %s3105_s26   ;;  %s3105_s26 = sphi %s3231_s26, %s33_s26   ;;  %s3101_s3 = sphi %s3229_s3, %s3758_s3   ;;  %s3097_s25 = sphi %s3227_s25, %s3757_s25   ;;  %s3093_s2 = sphi %s3225_s2, %s3761_s2   ;;  %s3089_s24 = sphi %s3223_s24, %s3755_s24   ;;  %s3085_s23 = sphi %s3221_s23, %s3754_s23   ;;  %s3081_s22 = sphi %s3219_s22, %s3760_s22   ;;  %s3077_s1 = sphi %s3217_s1, %s3759_s1  }
  0x17   : > { %3703 = sst [smem:[#allocation7_spill]] %s3085_s23  ;;  %s2536_s28 = sadd.s32 4294967294, %s3105_s26  }
  0x18   : > { %3704 = sst [smem:[#allocation8_spill]] %s3089_s24  ;;  %s42_s4 = sadd.s32 1, %s3097_s25 }
  0x19   : > { %3705 = sst [smem:[#allocation9_spill]] %s3093_s2  ;;  %p43_p0 = scmp.ge.s32.totalorder %s42_s4, 2 }
  0x1a   : > { %3706 = sst [smem:[#allocation10_spill]] %s3097_s25  ;;  %s45_s29 = sadd.s32 1, %s3101_s3 }
  0x1b   : > { %3707 = sst [smem:[#allocation11_spill]] %s3101_s3  ;;  %p567_p1 = scmp.ne.s32.totalorder %s3085_s23, %s3081_s22 }
  0x1c   : > { %3708 = sst [smem:[#allocation12_spill]] %s3105_s26  ;;  %p568_p2 = scmp.eq.s32.totalorder %s2535_s27, 3 }
  0x1d   : > { %s3763_s4 = smov (%p43_p0, %s42_s4), 0  ;;  %s3765_s29 = smov (!%p43_p0, %s45_s29), %s3101_s3 }
  0x1e   : > { %3709 = sst [smem:[#allocation13_spill]] %s3763_s4  ;;  %p3266_p3 = por %p568_p2, %p567_p1 }
  0x1f   : > { %p573_p4 = scmp.ne.s32.totalorder %s3081_s22, %s3077_s1  ;;  %p47_p5 = scmp.ge.s32.totalorder %s3765_s29, 2 }
  0x20   : > { %s3710_s30 = scalar_select %p3266_p3, 1, 0 }
  0x21   : > { %p574_p6 = scmp.eq.s32.totalorder %s2536_s28, 3  ;;  %p2539_p7 = scmp.ge.s32.totalorder %s3105_s26, 1 }
  0x22   : > { %3711 = sst [smem:[#allocation14_spill]] %s3710_s30  ;;  %p720_p8 = scmp.lt.s32.totalorder %s3105_s26, 5 }
  0x23   : > { %s3767_s29 = smov (%p47_p5, %s3765_s29), 0  ;;  %p3276_p9 = por %p574_p6, %p573_p4 }
  0x24   : > { %3712 = sst [smem:[#allocation15_spill]] %s3767_s29  ;;  %p721_p10 = pnand %p2539_p7, %p720_p8 }
  0x25   : > { %s3713_s0 = scalar_select %p3276_p9, 1, 0 }
  0x26   : > { %s554_s21 = ssub.s32 %s3101_s3, %s3767_s29  ;;  %s557_s27 = sadd.s32 1, %s3085_s23 }
  0x27   : > { %3714 = sst [smem:[#allocation16_spill]] %s3713_s0  ;;  %p555_p11 = scmp.eq.s32.totalorder %s554_s21, 0 }
  0x28   : > { %724 = sbr.rel (%p721_p10) target bundleno = 3947 (0xf6b), region = 100 }
  0x29   : > { %s3284_s4 = scalar_select %p555_p11, %s3085_s23, %s557_s27  }
  0x2b   : > { %3715 = sst [smem:[#allocation17_spill]] %s3284_s4 }
  0x2f   : > { %p840_p12 = scmp.lt.s32.totalorder %s3093_s2, 1  ;;  %p845_p13 = scmp.lt.s32.totalorder %s3089_s24, 1 }
  0x30   : > { %s3719_s15 = sld [smem:[#allocation23_spill]]  ;;  %s3720_s3 = sld [smem:[#allocation24_spill]] }
  0x31   : > { %s841_s25 = scalar_select %p840_p12, %s3093_s2, 1 }
  0x32   : > { %s3291_s1 = scalar_select %p845_p13, %s3089_s24, 1 }
  0x33   : > { %s2861_s21 = smul.u32 12, %s841_s25  ;;  %s3718_s2 = sld [smem:[#allocation20_spill]] }
  0x34   : > { %s2645_s17 = sshll.u32 %s3291_s1, 5  ;;  %s3721_s5 = sld [smem:[#allocation25_spill]] }
  0x35   : > { %s3722_s6 = sld [smem:[#allocation26_spill]]  ;;  %s3724_s7 = sld [smem:[#allocation27_spill]] }
  0x36   : > { %s3308_s25 = scalar_lea.vmem %s3719_s15, %s2645_s17  ;;  %s3313_s4 = scalar_lea.vmem %s3720_s3, %s2645_s17 }
  0x37   : > { %s3725_s8 = sld [smem:[#allocation28_spill]]  ;;  %s2648_s23 = sshll.u32 %s3291_s1, 4 }
  0x38   : > { %s3726_s9 = sld [smem:[#allocation29_spill]]  ;;  %s891_s29 = scalar_lea.vmem %s3661_s12, %s3291_s1 }
  0x39   : > { %s844_s18 = scalar_lea.vmem %s3718_s2, %s2861_s21  ;;  %s2547_s2 = sshll.u32 %s3291_s1, 1 }
  0x3a   : > { %s3318_s20 = scalar_lea.vmem %s3721_s5, %s2645_s17  ;;  %s907_s28 = scalar_lea.vmem %s3665_s16, %s3291_s1 }
  0x3b   : > { %s3324_s21 = scalar_lea.vmem %s3722_s6, %s2547_s2  ;;  %s3329_s24 = scalar_lea.vmem %s3724_s7, %s2547_s2 }
  0x3c   : > { %3723 = sst [smem:[#allocation18_spill]] %s3324_s21  ;;  %s3729_s19 = sld [smem:[#allocation31_spill]] }
  0x3d   : > { %s3334_s3 = scalar_lea.vmem %s3725_s8, %s2547_s2  ;;  %s3357_s8 = scalar_lea.vmem %s3662_s13, %s2648_s23 }
  0x3e   : > { %s3340_s26 = scalar_lea.vmem %s3726_s9, %s2648_s23  ;;  %s899_s9 = scalar_lea.vmem %s3663_s14, %s3291_s1 }
  0x3f   : > { %3727 = sst [smem:[#allocation19_spill]] %s3340_s26  ;;  %s2650_s26 = sshll.u32 %s3291_s1, 6 }
  0x40   : > { %s3730_s7 = sand.u32 1, %s3081_s22   ;;  %s3731_s2 = sld [smem:[#allocation8_spill]] }
  0x41   : > { %s3375_s15 = scalar_lea.vmem [#allocation3], %s3730_s7 }
  0x42   : > { %s3371_s11 = scalar_lea.vmem %s3729_s19, %s2650_s26 }
  0x46   : > { %p2556_p0 = scmp.ne.s32.totalorder %s3731_s2, 0 }
  0x47   : > { %v2652_v0 = vld [vmem:[%s844_s18] sm:$0xff] (!%p2556_p0)   ;;  %vm919_vm0 = vcmask (!%p2556_p0), 261120   ;;  %v915_v1 = vld [vmem:[%s844_s18 + $0x8] sm:$0x1] (!%p2556_p0)  ;;  %vm922_vm1 = vcmask (!%p2556_p0), 253952  }
  0x48   : > { %912 = sbr.rel (%p2556_p0) target bundleno = 79 (0x4f), region = 104  ;;  %v2653_v2 = vunpack.c.l.bf16 (!%p2556_p0), %v2652_v0  ;;  %v2654_v3 = vunpack.c.h.bf16 (!%p2556_p0), %v2652_v0  ;;  %v918_v4 = vunpack.c.l.bf16 (!%p2556_p0), %v915_v1 }
  0x4a   : > { %920 = vst.msk [vmem:[#allocation2] sm:$0xff] (!%p2556_p0), %vm919_vm0, %v2653_v2  ;;  %921 = vst.msk [vmem:[#allocation2 + $0x8] sm:$0xff] (!%p2556_p0), %vm919_vm0, %v2654_v3 }
  0x4b   : > { %923 = vst.msk [vmem:[#allocation2 + $0x10] sm:$0x1] (!%p2556_p0), %vm922_vm1, %v918_v4 }
  0x4f PF: > { %vm929_vm2 = vcmask 261120   ;;  %vm936_vm3 = vcmask 253952   ;;  %v2937_v26 = vld [vmem:[%s3308_s25] sm:$0xff]   ;;  %v2938_v27 = vld [vmem:[%s3308_s25 + $0x8] sm:$0xff]   ;;  %s3732_s23 = sld [smem:[#allocation21_spill]]  ;;  %s3734_s17 = sld [smem:[#allocation22_spill]] }
  0x50   : > { %2720 = vmatprep.subr.bf16.mxu0 %v2937_v26  ;;  %v2939_v28 = vld [vmem:[%s3313_s4] sm:$0xff]   ;;  %v2940_v54 = vld [vmem:[%s3313_s4 + $0x8] sm:$0xff]   ;;  %s3736_s30 = sld [smem:[#allocation18_spill]]  ;;  %vm1221_vm4 = vcmask 130048   ;;  %vm1327_vm5 = vcmask 1040384   ;;  %vm1282_vm6 = vcmask 138240  }
  0x51   : > { %v3378_v5 = vld [vmem:[#allocation2] sm:$0xff]  ;;  %v3382_v7 = vld [vmem:[#allocation2 + $0x8] sm:$0xff]  ;;  %2721 = vmatpush3.bf16.msra.mxu0 %v2937_v26  ;;  %vm1289_vm7 = vcmask 131072  }
  0x52   : > { %v3380_v6 = vld [vmem:[#allocation2 + $0x10] sm:$0x1]  ;;  %v930_v8 = vsel %vm929_vm2, %v3378_v5, 0.0  ;;  %v933_v10 = vsel %vm929_vm2, %v3382_v7, 0.0  ;;  %2722 = vmatprep.subr.bf16.mxu0 %v2938_v27  ;;  %v2941_v55 = vld [vmem:[%s3318_s20] sm:$0xff]   ;;  %v2942_v56 = vld [vmem:[%s3318_s20 + $0x8] sm:$0xff]  }
  0x53   : > { %v937_v9 = vsel %vm936_vm3, %v3380_v6, 0.0  ;;  %931 = vadd.xlane.f32.xlu0 %v930_v8  ;;  %v2565_v2 = vld [vmem:[%s3329_s24] ss:$0 sm:$0xff] }
  0x54   : > { %938 = vadd.xlane.f32.xlu1 %v937_v9 }
  0x55   : > { %2723 = vmatpush3.bf16.msra.mxu0 %v2938_v27  ;;  %s3733_s19 = scalar_lea.vmem %s3732_s23, %s3291_s1  ;;  %s3735_s5 = scalar_lea.vmem %s3734_s17, %s3291_s1  ;;  %v2943_v27 = vld [vmem:[%s3308_s25 + $0x10] sm:$0xff]  }
  0x56   : > { %2728 = vmatprep.subr.bf16.mxu0 %v2939_v28  ;;  %v2557_v40 = vld [vmem:[%s3733_s19] ss:$0 sm:$0xff] }
  0x57   : > { %934 = vadd.xlane.f32.xlu0 %v933_v10  ;;  %v2558_v46 = vld [vmem:[%s3735_s5] ss:$0 sm:$0xff] }
  0x58   : > { %v2560_v58 = vld [vmem:[%s3736_s30] ss:$0 sm:$0xff] }
  0xe0   : > { %v932_v11 = vpop.xlane.xlu0 %931 }
  0xe1   : > { %v939_v12 = vpop.xlane.xlu1 %938  ;;  %v941_v13 = vmul.f32 0.03125, %v932_v11 }
  0xe2   : > { %v943_v14 = vmul.f32 0.03125, %v939_v12  ;;  %v2570_v12 = vld [vmem:[%s3334_s3] ss:$0 sm:$0xff] }
  0xe3   : > { %v944_v15 = vsub.f32 %v3378_v5, %v941_v13 }
  0xe4   : > { %v946_v16 = vsub.f32 %v3380_v6, %v943_v14  ;;  %v935_v17 = vpop.xlane.xlu0 %934 }
  0xe5   : > { %v942_v18 = vmul.f32 0.03125, %v935_v17  ;;  %v947_v19 = vmul.f32 %v944_v15, %v944_v15 }
  0xe6   : > { %v949_v20 = vmul.f32 %v946_v16, %v946_v16 }
  0xe7   : > { %v945_v21 = vsub.f32 %v3382_v7, %v942_v18  ;;  %v950_v22 = vsel %vm929_vm2, %v947_v19, 0.0 }
  0xe8   : > { %951 = vadd.xlane.f32.xlu1 %v950_v22  ;;  %v956_v23 = vsel %vm936_vm3, %v949_v20, 0.0 }
  0xe9   : > { %v948_v24 = vmul.f32 %v945_v21, %v945_v21 }
  0xeb   : > { %v953_v25 = vsel %vm929_vm2, %v948_v24, 0.0  ;;  %v3107_v24 = vmov 0  }
  0xec   : > { %957 = vadd.xlane.f32.xlu1 %v956_v23  ;;  %954 = vadd.xlane.f32.xlu0 %v953_v25  ;;  %v1329_v25 = vsel %vm1327_vm5, 65535, %v3107_v24 }
 0x175   : > { %v952_v29 = vpop.xlane.xlu1 %951 }
 0x176   : > { %v959_v30 = vmul.f32 0.03125, %v952_v29 }
 0x178   : > { %v962_v31 = vadd.f32 1e-05, %v959_v30 }
 0x179   : > { %v958_v32 = vpop.xlane.xlu1 %957  ;;  %v955_v33 = vpop.xlane.xlu0 %954 }
 0x17a   : > { %2961 = vrsqrt.f32 %v962_v31  ;;  %v961_v34 = vmul.f32 0.03125, %v958_v32  ;;  %v960_v35 = vmul.f32 0.03125, %v955_v33  ;;  %v2944_v32 = vld [vmem:[%s3308_s25 + $0x18] sm:$0xff]   ;;  %v2945_v33 = vld [vmem:[%s3318_s20 + $0x10] sm:$0xff]   ;;  %s3737_s25 = sld [smem:[#allocation19_spill]] }
 0x17c   : > { %v964_v36 = vadd.f32 1e-05, %v961_v34  ;;  %v963_v37 = vadd.f32 1e-05, %v960_v35  ;;  %v2946_v34 = vld [vmem:[%s3318_s20 + $0x18] sm:$0xff]  }
 0x17e   : > { %2963 = vrsqrt.f32 %v964_v36 }
 0x17f   : > { %2965 = vrsqrt.f32 %v963_v37 }
 0x184   : > { %v2962_v38 = vpop.eup %2961 }
 0x185   : > { %v968_v39 = vmul.f32 %v2962_v38, %v944_v15 }
 0x187   : > { %v977_v44 = vmul.f32 %v2557_v40, %v968_v39 }
 0x188   : > { %v2964_v41 = vpop.eup %2963 }
 0x189   : > { %v2966_v42 = vpop.eup %2965  ;;  %v970_v43 = vmul.f32 %v2964_v41, %v946_v16  ;;  %v986_v50 = vadd.f32 %v2558_v46, %v977_v44 }
 0x18a   : > { %v969_v45 = vmul.f32 %v2966_v42, %v945_v21  ;;  %v2587_v42 = vld [vmem:[%s3736_s30 + $0x1] ss:$0 sm:$0xff] }
 0x18b   : > { %v979_v47 = vmul.f32 %v2557_v40, %v970_v43 }
 0x18c   : > { %v978_v48 = vmul.f32 %v2557_v40, %v969_v45 }
 0x18d   : > { %v988_v49 = vadd.f32 %v2558_v46, %v979_v47 }
 0x18e   : > { %v987_v51 = vadd.f32 %v2558_v46, %v978_v48 }
 0x18f   : > { %v3409_v52 = vpack.c.bf16 %v988_v49, %v988_v49 }
 0x190   : > { %v3411_v53 = vpack.c.bf16 %v987_v51, %v986_v50  ;;  %v2607_v51 = vld [vmem:[%s3334_s3 + $0x1] ss:$0 sm:$0xff] }
 0x192   : > { %2724 = vmatprep.mubr.msk.bf16.mxu0 %vm929_vm2, %v3411_v53 }
 0x193   : > { %2725 = vmatmul.mubr.msk.bf16.vlgmr.msra.gmra.mrb[0].mxu0 %vm929_vm2, %v3409_v52 }
 0x194   : > { %2729 = vmatpush3.bf16.msra.mxu0 %v2939_v28  ;;  %2732 = vmatprep.mubr.msk.bf16.mxu0 %vm929_vm2, %v3411_v53 }
 0x195   : > { %2730 = vmatprep.subr.bf16.mxu0 %v2940_v54 }
 0x198   : > { %2731 = vmatpush3.bf16.msra.mxu0 %v2940_v54 }
 0x199   : > { %2736 = vmatprep.subr.bf16.mxu0 %v2941_v55 }
 0x19b   : > { %2733 = vmatmul.mubr.msk.bf16.vlgmr.msra.gmra.mrb[4].mxu0 %vm929_vm2, %v3409_v52 }
 0x19c   : > { %2737 = vmatpush3.bf16.msra.mxu0 %v2941_v55  ;;  %2740 = vmatprep.mubr.msk.bf16.mxu0 %vm929_vm2, %v3411_v53 }
 0x19d   : > { %2738 = vmatprep.subr.bf16.mxu0 %v2942_v56 }
 0x1a0   : > { %2739 = vmatpush3.bf16.msra.mxu0 %v2942_v56 }
 0x1a3   : > { %2741 = vmatmul.mubr.msk.bf16.vlgmr.msra.gmra.mrb[8].mxu0 %vm929_vm2, %v3409_v52 }
 0x266   : > { %v2726_v57 = vpop.f32.mrb[0].mxu0 }
 0x267   : > { %v1061_v59 = vpop.f32.mrb[1].mxu0  ;;  %v1070_v30 = vadd.f32 %v2726_v57, %v2560_v58 }
 0x268   : > { %v2727_v60 = vpop.f32.mrb[2].mxu0  ;;  %v1062_v62 = vadd.f32 %v2560_v58, %v1061_v59 }
 0x269   : > { %v1064_v61 = vpop.f32.mrb[3].mxu0  ;;  %v1218_v31 = vpack.c.bf16 %v1070_v30, %v1070_v30  ;;  %v2948_v30 = vld [vmem:[%s3313_s4 + $0x10] sm:$0xff]  }
 0x26a   : > { %v1065_v63 = vadd.f32 %v2560_v58, %v1064_v61 }
 0x26c   : > { %v1217_v0 = vpack.c.bf16 %v1065_v63, %v1062_v62 }
 0x26e   : > { %v2734_v1 = vpop.f32.mrb[4].mxu0  ;;  %2748 = vmatprep.mubr.msk.bf16.mxu1 %vm1221_vm4, %v1217_v0 }
 0x26f   : > { %v1132_v3 = vpop.f32.mrb[5].mxu0  ;;  %v1141_v9 = vadd.f32 %v2734_v1, %v2565_v2 }
 0x270   : > { %v2735_v4 = vpop.f32.mrb[6].mxu0  ;;  %v1133_v10 = vadd.f32 %v2565_v2, %v1132_v3 }
 0x271   : > { %v1135_v8 = vpop.f32.mrb[7].mxu0  ;;  %v1220_v14 = vpack.c.bf16 %v1141_v9, %v1141_v9 }
 0x272   : > { %v1136_v11 = vadd.f32 %v2565_v2, %v1135_v8 }
 0x273   : > { %v1232_v29 = vsel %vm1221_vm4, %v1220_v14, 0 }
 0x274   : > { %v1219_v13 = vpack.c.bf16 %v1136_v11, %v1133_v10 }
 0x276   : > { %v2742_v15 = vpop.f32.mrb[8].mxu0  ;;  %2857 = vmatprep.subr.msk.bf16.mxu1 %vm1221_vm4, %v1219_v13  ;;  %v1229_v16 = vsel %vm1221_vm4, %v1219_v13, 0 }
 0x277   : > { %v1212_v17 = vadd.f32 %v2742_v15, %v2570_v12  ;;  %v1203_v18 = vpop.f32.mrb[9].mxu0  ;;  %2745 = vmatpush3.bf16.xpose.msra.mxu1 %v1229_v16 }
 0x278   : > { %v2743_v19 = vpop.f32.mrb[10].mxu0  ;;  %2858 = vmatprep.subr.msk.bf16.mxu1 %vm1221_vm4, %v1220_v14  ;;  %v1204_v22 = vadd.f32 %v2570_v12, %v1203_v18  ;;  %v2947_v18 = vld [vmem:[%s3737_s25] sm:$0xff]  }
 0x279   : > { %v1206_v20 = vpop.f32.mrb[11].mxu0  ;;  %v1320_v21 = vpack.c.bf16 %v1212_v17, %v1212_v17 }
 0x27a   : > { %v1207_v23 = vadd.f32 %v2570_v12, %v1206_v20 }
 0x27b   : > { %v1331_v28 = vand.u32 %v1329_v25, %v1320_v21 }
 0x27c   : > { %v1319_v26 = vpack.c.bf16 %v1207_v23, %v1204_v22 }
 0x27e   : > { %2752 = vmatprep.subr.bf16.mxu0 %v1319_v26 }
 0x27f   : > { %2747 = vmatpush3.bf16.xpose.msra.mxu1 %v1232_v29  ;;  %2753 = vmatpush3.bf16.msra.mxu0 %v1319_v26 }
 0x280   : > { %2754 = vmatprep.subr.bf16.mxu0 %v1331_v28  ;;  %2766 = vmatprep.subr.bf16.mxu1 %v2943_v27 }
 0x283   : > { %2755 = vmatpush3.bf16.msra.mxu0 %v1331_v28 }
 0x284   : > { %2760 = vmatprep.subr.bf16.mxu0 %v2947_v18 }
 0x286   : > { %2749 = vmatmul.mubr.msk.bf16.vlgmr.msra.gmra.mrb[0].mxu1 %vm1221_vm4, %v1218_v31 }
 0x287   : > { %2767 = vmatpush3.bf16.msra.mxu1 %v2943_v27  ;;  %2770 = vmatprep.mubr.msk.bf16.mxu1 %vm929_vm2, %v3411_v53 }
 0x288   : > { %2768 = vmatprep.subr.bf16.mxu1 %v2944_v32 }
 0x28b   : > { %2769 = vmatpush3.bf16.msra.mxu1 %v2944_v32 }
 0x28c   : > { %2782 = vmatprep.subr.bf16.mxu1 %v2945_v33 }
 0x28e   : > { %2771 = vmatmul.mubr.msk.bf16.vlgmr.msra.gmra.mrb[4].mxu1 %vm929_vm2, %v3409_v52 }
 0x28f   : > { %2783 = vmatpush3.bf16.msra.mxu1 %v2945_v33  ;;  %2786 = vmatprep.mubr.msk.bf16.mxu1 %vm929_vm2, %v3411_v53 }
 0x290   : > { %2784 = vmatprep.subr.bf16.mxu1 %v2946_v34 }
 0x293   : > { %2785 = vmatpush3.bf16.msra.mxu1 %v2946_v34 }
 0x296   : > { %2787 = vmatmul.mubr.msk.bf16.vlgmr.msra.gmra.mrb[8].mxu1 %vm929_vm2, %v3409_v52 }
 0x359   : > { %v2750_v35 = vpop.f32.mrb[0].mxu1 }
 0x35a   : > { %v1268_v36 = vpop.f32.mrb[1].mxu1  ;;  %v1290_v41 = vsel %vm1289_vm7, %v2750_v35, -inf }
 0x35b   : > { %v2751_v37 = vpop.f32.mrb[2].mxu1  ;;  %v1283_v38 = vsel %vm1282_vm6, %v1268_v36, -inf }
 0x35c   : > { %1284 = vmax.xlane.f32.xlu0 %v1283_v38  ;;  %v1271_v39 = vpop.f32.mrb[3].mxu1  ;;  %v2949_v37 = vld [vmem:[%s3313_s4 + $0x18] sm:$0xff]  }
 0x35d   : > { %v1286_v40 = vsel %vm1282_vm6, %v1271_v39, -inf }
 0x35e   : > { %1287 = vmax.xlane.f32.xlu1 %v1286_v40 }
 0x360   : > { %1291 = vmax.xlane.f32.xlu0 %v1290_v41 }
 0x361   : > { %v2772_v43 = vpop.f32.mrb[4].mxu1 }
 0x362   : > { %v3453_v44 = vadd.f32 %v2772_v43, %v2587_v42  ;;  %v1507_v45 = vpop.f32.mrb[5].mxu1  ;;  %v2597_v43 = vld [vmem:[%s3329_s24 + $0x1] ss:$0 sm:$0xff]  ;;  %s3738_s24 = scalar_lea.vmem %s3659_s10, %s3291_s1 }
 0x363   : > { %v2773_v46 = vpop.f32.mrb[6].mxu1  ;;  %v3455_v48 = vadd.f32 %v2587_v42, %v1507_v45 }
 0x364   : > { %v1510_v47 = vpop.f32.mrb[7].mxu1 }
 0x365   : > { %v3457_v49 = vadd.f32 %v2587_v42, %v1510_v47 }
 0x367   : > { %v1667_v50 = vpack.c.bf16 %v3457_v49, %v3455_v48 }
 0x369   : > { %v2788_v54 = vpop.f32.mrb[8].mxu1 }
 0x36a   : > { %v1662_v55 = vadd.f32 %v2788_v54, %v2607_v51  ;;  %v1653_v56 = vpop.f32.mrb[9].mxu1 }
 0x36b   : > { %v2789_v57 = vpop.f32.mrb[10].mxu1  ;;  %v1654_v60 = vadd.f32 %v2607_v51, %v1653_v56 }
 0x36c   : > { %v1656_v58 = vpop.f32.mrb[11].mxu1  ;;  %v1767_v59 = vpack.c.bf16 %v1662_v55, %v1662_v55 }
 0x36d   : > { %v1657_v61 = vadd.f32 %v2607_v51, %v1656_v58 }
 0x36e   : > { %v1775_v63 = vand.u32 %v1767_v59, %v1329_v25 }
 0x36f   : > { %v1766_v62 = vpack.c.bf16 %v1657_v61, %v1654_v60 }
 0x371   : > { %2798 = vmatprep.subr.bf16.mxu1 %v1766_v62 }
 0x372   : > { %2799 = vmatpush3.bf16.msra.mxu1 %v1766_v62 }
 0x373   : > { %2800 = vmatprep.subr.bf16.mxu1 %v1775_v63 }
 0x376   : > { %2801 = vmatpush3.bf16.msra.mxu1 %v1775_v63 }
 0x3e9   : > { %v1285_v0 = vpop.xlane.xlu0 %1284 }
 0x3ea   : > { %v1293_v1 = vsub.f32 %v1268_v36, %v1285_v0 }
 0x3eb   : > { %v1288_v2 = vpop.xlane.xlu1 %1287 }
 0x3ec   : > { %v1296_v3 = vmul.f32 1.442695, %v1293_v1  ;;  %v1294_v4 = vsub.f32 %v1271_v39, %v1288_v2 }
 0x3ed   : > { %v1292_v8 = vpop.xlane.xlu0 %1291 }
 0x3ee   : > { %2967 = vpow2.f32 %v1296_v3  ;;  %v1298_v9 = vmul.f32 1.442695, %v1294_v4  ;;  %v1295_v10 = vsub.f32 %v2750_v35, %v1292_v8 }
 0x3f0   : > { %2969 = vpow2.f32 %v1298_v9  ;;  %v1300_v11 = vmul.f32 1.442695, %v1295_v10 }
 0x3f2   : > { %2971 = vpow2.f32 %v1300_v11 }
 0x3f8   : > { %v2968_v12 = vpop.eup %2967 }
 0x3f9   : > { %v1302_v13 = vsel %vm1282_vm6, %v2968_v12, 0.0 }
 0x3fa   : > { %v2970_v14 = vpop.eup %2969  ;;  %1303 = vadd.xlane.f32.xlu1 %v1302_v13 }
 0x3fb   : > { %v1305_v15 = vsel %vm1282_vm6, %v2970_v14, 0.0 }
 0x3fc   : > { %v2972_v16 = vpop.eup %2971  ;;  %1306 = vadd.xlane.f32.xlu0 %v1305_v15 }
 0x3fd   : > { %v1308_v17 = vsel %vm1289_vm7, %v2972_v16, 0.0 }
 0x3fe   : > { %1309 = vadd.xlane.f32.xlu1 %v1308_v17 }
 0x487   : > { %v1304_v19 = vpop.xlane.xlu1 %1303 }
 0x488   : > { %2973 = vrcp.f32 %v1304_v19 }
 0x489   : > { %v1307_v20 = vpop.xlane.xlu0 %1306 }
 0x48a   : > { %2975 = vrcp.f32 %v1307_v20 }
 0x48b   : > { %v1310_v21 = vpop.xlane.xlu1 %1309 }
 0x48c   : > { %2977 = vrcp.f32 %v1310_v21 }
 0x492   : > { %v2974_v22 = vpop.eup %2973 }
 0x493   : > { %v1314_v24 = vmul.f32 %v2974_v22, %v2968_v12 }
 0x494   : > { %v2976_v23 = vpop.eup %2975 }
 0x495   : > { %v1315_v25 = vmul.f32 %v2976_v23, %v2970_v14 }
 0x496   : > { %v2978_v26 = vpop.eup %2977 }
 0x497   : > { %v1316_v27 = vmul.f32 %v2978_v26, %v2972_v16  ;;  %v1317_v28 = vpack.c.bf16 %v1315_v25, %v1314_v24  ;;  %v2950_v16 = vld [vmem:[%s3737_s25 + $0x8] sm:$0xff]  }
 0x498   : > { %2806 = vmatprep.subr.bf16.mxu1 %v2950_v16 }
 0x499   : > { %2756 = vmatprep.mubr.msk.bf16.mxu0 %vm1282_vm6, %v1317_v28  ;;  %v1318_v29 = vpack.c.bf16 %v1316_v27, %v1316_v27 }
 0x49b   : > { %2757 = vmatmul.mubr.msk.bf16.vlgmr.msra.gmra.mrb[12].mxu0 %vm1282_vm6, %v1318_v29 }
 0x49c   : > { %2761 = vmatpush3.bf16.msra.mxu0 %v2947_v18 }
 0x49d   : > { %2774 = vmatprep.subr.bf16.mxu0 %v2948_v30 }
 0x56e   : > { %v2758_v31 = vpop.f32.mrb[12].mxu0 }
 0x56f   : > { %v1367_v32 = vpop.f32.mrb[13].mxu0  ;;  %v1382_v36 = vpack.c.bf16 %v2758_v31, %v2758_v31 }
 0x570   : > { %v2759_v33 = vpop.f32.mrb[14].mxu0 }
 0x571   : > { %v1370_v34 = vpop.f32.mrb[15].mxu0 }
 0x572   : > { %v1381_v35 = vpack.c.bf16 %v1370_v34, %v1367_v32  ;;  %v2559_v34 = vld [vmem:[%s3738_s24] ss:$0 sm:$0xff] }
 0x574   : > { %2762 = vmatprep.mubr.msk.bf16.mxu0 %vm1221_vm4, %v1381_v35 }
 0x575   : > { %2763 = vmatmul.mubr.msk.bf16.vlgmr.msra.gmra.mrb[16].mxu0 %vm1221_vm4, %v1382_v36 }
 0x576   : > { %2775 = vmatpush3.bf16.msra.mxu0 %v2948_v30  ;;  %2778 = vmatprep.mubr.msk.bf16.mxu0 %vm929_vm2, %v3411_v53 }
 0x577   : > { %2776 = vmatprep.subr.bf16.mxu0 %v2949_v37 }
 0x57a   : > { %2777 = vmatpush3.bf16.msra.mxu0 %v2949_v37 }
 0x57d   : > { %2779 = vmatmul.mubr.msk.bf16.vlgmr.msra.gmra.mrb[20].mxu0 %vm929_vm2, %v3409_v52 }
 0x57e   : > { %2794 = vmatprep.mubr.msk.bf16.mxu0 %vm1221_vm4, %v1667_v50  ;;  %v1668_v50 = vpack.c.bf16 %v3453_v44, %v3453_v44 }
 0x648   : > { %v3480_v38 = vpop.f32.mrb[16].mxu0 }
 0x649   : > { %v3482_v39 = vpop.f32.mrb[17].mxu0  ;;  %v1447_v35 = vadd.f32 %v3480_v38, %v2559_v34 }
 0x64a   : > { %v2765_v40 = vpop.f32.mrb[18].mxu0  ;;  %v1445_v36 = vadd.f32 %v2559_v34, %v3482_v39 }
 0x64b   : > { %v3484_v41 = vpop.f32.mrb[19].mxu0 }
 0x650   : > { %v2780_v42 = vpop.f32.mrb[20].mxu0 }
 0x651   : > { %v1580_v53 = vpop.f32.mrb[21].mxu0  ;;  %v1589_v47 = vadd.f32 %v2780_v42, %v2597_v43 }
 0x652   : > { %v2781_v45 = vpop.f32.mrb[22].mxu0  ;;  %v1581_v51 = vadd.f32 %v2597_v43, %v1580_v53 }
 0x653   : > { %v1583_v46 = vpop.f32.mrb[23].mxu0  ;;  %v1670_v55 = vpack.c.bf16 %v1589_v47, %v1589_v47 }
 0x654   : > { %v1584_v52 = vadd.f32 %v2597_v43, %v1583_v46  ;;  %v1446_v43 = vadd.f32 %v2559_v34, %v3484_v41  ;;  %v2958_v34 = vld [vmem:[%s3371_s11 + $0x28] sm:$0xff]  }
 0x655   : > { %v1681_v49 = vsel %vm1221_vm4, %v1670_v55, 0 }
 0x656   : > { %v1669_v54 = vpack.c.bf16 %v1584_v52, %v1581_v51 }
 0x658   : > { %2859 = vmatprep.subr.msk.bf16.mxu0 %vm1221_vm4, %v1669_v54  ;;  %v1678_v48 = vsel %vm1221_vm4, %v1669_v54, 0 }
 0x659   : > { %2791 = vmatpush3.bf16.xpose.msra.mxu0 %v1678_v48 }
 0x65a   : > { %2860 = vmatprep.subr.msk.bf16.mxu0 %vm1221_vm4, %v1670_v55 }
 0x661   : > { %2793 = vmatpush3.bf16.xpose.msra.mxu0 %v1681_v49 }
 0x668   : > { %2795 = vmatmul.mubr.msk.bf16.vlgmr.msra.gmra.mrb[24].mxu0 %vm1221_vm4, %v1668_v50 }
 0x73b   : > { %v2796_v56 = vpop.f32.mrb[24].mxu0 }
 0x73c   : > { %v1717_v57 = vpop.f32.mrb[25].mxu0  ;;  %v1737_v62 = vsel %vm1289_vm7, %v2796_v56, -inf }
 0x73d   : > { %v2797_v58 = vpop.f32.mrb[26].mxu0  ;;  %v1731_v59 = vsel %vm1282_vm6, %v1717_v57, -inf }
 0x73e   : > { %1732 = vmax.xlane.f32.xlu0 %v1731_v59  ;;  %v1720_v60 = vpop.f32.mrb[27].mxu0 }
 0x73f   : > { %v1734_v61 = vsel %vm1282_vm6, %v1720_v60, -inf }
 0x740   : > { %1735 = vmax.xlane.f32.xlu1 %v1734_v61 }
 0x742   : > { %1738 = vmax.xlane.f32.xlu0 %v1737_v62 }
 0x7cb   : > { %v1733_v63 = vpop.xlane.xlu0 %1732 }
 0x7cc   : > { %v1740_v0 = vsub.f32 %v1717_v57, %v1733_v63 }
 0x7cd   : > { %v1736_v1 = vpop.xlane.xlu1 %1735 }
 0x7ce   : > { %v1743_v2 = vmul.f32 1.442695, %v1740_v0  ;;  %v1741_v44 = vsub.f32 %v1720_v60, %v1736_v1  ;;  %v2951_v0 = vld [vmem:[%s3357_s8] sm:$0xff]   ;;  %v2952_v1 = vld [vmem:[%s3357_s8 + $0x8] sm:$0xff]   ;;  %s3739_s8 = sld [smem:[#allocation30_spill]] }
 0x7cf   : > { %v1739_v3 = vpop.xlane.xlu0 %1738  ;;  %2812 = vmatprep.subr.bf16.mxu0 %v2951_v0 }
 0x7d0   : > { %2979 = vpow2.f32 %v1743_v2  ;;  %v1745_v4 = vmul.f32 1.442695, %v1741_v44  ;;  %v1742_v8 = vsub.f32 %v2796_v56, %v1739_v3  ;;  %2813 = vmatpush3.bf16.msra.mxu0 %v2951_v0 }
 0x7d1   : > { %2814 = vmatprep.subr.bf16.mxu0 %v2952_v1 }
 0x7d2   : > { %2981 = vpow2.f32 %v1745_v4  ;;  %v1747_v9 = vmul.f32 1.442695, %v1742_v8 }
 0x7d4   : > { %2983 = vpow2.f32 %v1747_v9  ;;  %2815 = vmatpush3.bf16.msra.mxu0 %v2952_v1  ;;  %s3740_s21 = scalar_lea.vmem %s3739_s8, %s3291_s1  ;;  %s3741_s1 = sld [smem:[#allocation8_spill]] }
 0x7da   : > { %v2980_v10 = vpop.eup %2979  ;;  %p2640_p1 = scmp.ne.s32.totalorder %s3741_s1, 1 }
 0x7db   : > { %v1749_v11 = vsel %vm1282_vm6, %v2980_v10, 0.0  ;;  %s3742_s23 = sld [smem:[#allocation34_spill]] (!%p2640_p1)  ;;  %vm3109_vm8 = vmmov (!%p2640_p1), 0   ;;  %s3744_s24 = sld [smem:[#allocation32_spill]] (!%p2640_p1)  ;;  %vm2283_vm9 = vcmask (!%p2640_p1), 122880  }
 0x7dc   : > { %v2982_v12 = vpop.eup %2981  ;;  %1750 = vadd.xlane.f32.xlu1 %v1749_v11  ;;  %s3745_s8 = sld [smem:[#allocation33_spill]] (!%p2640_p1) }
 0x7dd   : > { %v1752_v13 = vsel %vm1282_vm6, %v2982_v12, 0.0 }
 0x7de   : > { %v2984_v14 = vpop.eup %2983  ;;  %1753 = vadd.xlane.f32.xlu0 %v1752_v13 }
 0x7df   : > { %v1755_v15 = vsel %vm1289_vm7, %v2984_v14, 0.0 }
 0x7e0   : > { %1756 = vadd.xlane.f32.xlu1 %v1755_v15 }
 0x7e1   : > { %s3743_s19 = smov (!%p2640_p1), %s3742_s23 }
 0x869   : > { %v1751_v17 = vpop.xlane.xlu1 %1750 }
 0x86a   : > { %2985 = vrcp.f32 %v1751_v17 }
 0x86b   : > { %v1754_v18 = vpop.xlane.xlu0 %1753 }
 0x86c   : > { %2987 = vrcp.f32 %v1754_v18 }
 0x86d   : > { %v1757_v19 = vpop.xlane.xlu1 %1756 }
 0x86e   : > { %2989 = vrcp.f32 %v1757_v19 }
 0x874   : > { %v2986_v20 = vpop.eup %2985 }
 0x875   : > { %v1761_v22 = vmul.f32 %v2986_v20, %v2980_v10  ;;  %v2622_v20 = vld [vmem:[%s891_s29] ss:$0 sm:$0xff] }
 0x876   : > { %v2988_v21 = vpop.eup %2987 }
 0x877   : > { %v1762_v23 = vmul.f32 %v2988_v21, %v2982_v12 }
 0x878   : > { %v2990_v24 = vpop.eup %2989 }
 0x879   : > { %v1763_v25 = vmul.f32 %v2990_v24, %v2984_v14  ;;  %v1764_v26 = vpack.c.bf16 %v1762_v23, %v1761_v22  ;;  %v2621_v14 = vld [vmem:[%s3740_s21] ss:$0 sm:$0xff] }
 0x87b   : > { %2802 = vmatprep.mubr.msk.bf16.mxu1 %vm1282_vm6, %v1764_v26  ;;  %v1765_v27 = vpack.c.bf16 %v1763_v25, %v1763_v25 }
 0x87d   : > { %2803 = vmatmul.mubr.msk.bf16.vlgmr.msra.gmra.mrb[12].mxu1 %vm1282_vm6, %v1765_v27 }
 0x87e   : > { %2807 = vmatpush3.bf16.msra.mxu1 %v2950_v16 }
 0x950   : > { %v2804_v28 = vpop.f32.mrb[12].mxu1 }
 0x951   : > { %v1811_v29 = vpop.f32.mrb[13].mxu1  ;;  %v1826_v33 = vpack.c.bf16 %v2804_v28, %v2804_v28 }
 0x952   : > { %v2805_v30 = vpop.f32.mrb[14].mxu1 }
 0x953   : > { %v1814_v31 = vpop.f32.mrb[15].mxu1  ;;  %v2954_v30 = vld [vmem:[%s3371_s11 + $0x8] sm:$0xff]  }
 0x954   : > { %v1825_v32 = vpack.c.bf16 %v1814_v31, %v1811_v29  ;;  %v2953_v29 = vld [vmem:[%s3371_s11] sm:$0xff]   ;;  %v2955_v31 = vld [vmem:[%s3371_s11 + $0x10] sm:$0xff]  }
 0x955   : > { %2820 = vmatprep.subr.bf16.mxu1 %v2953_v29 }
 0x956   : > { %2808 = vmatprep.mubr.msk.bf16.mxu1 %vm1221_vm4, %v1825_v32  ;;  %v2956_v32 = vld [vmem:[%s3371_s11 + $0x18] sm:$0xff]  }
 0x957   : > { %2809 = vmatmul.mubr.msk.bf16.vlgmr.msra.gmra.mrb[16].mxu1 %vm1221_vm4, %v1826_v33  ;;  %v2957_v33 = vld [vmem:[%s3371_s11 + $0x20] sm:$0xff]  }
 0x958   : > { %2821 = vmatpush3.bf16.msra.mxu1 %v2953_v29 }
 0x959   : > { %2822 = vmatprep.subr.bf16.mxu1 %v2954_v30 }
 0x95c   : > { %2823 = vmatpush3.bf16.msra.mxu1 %v2954_v30  ;;  %v2189_v30 = vld [vmem:[%s3744_s24] sm:$0x1] (!%p2640_p1) }
 0x95d   : > { %2824 = vmatprep.subr.bf16.mxu1 %v2955_v31 }
 0x960   : > { %2825 = vmatpush3.bf16.msra.mxu1 %v2955_v31 }
 0x961   : > { %2826 = vmatprep.subr.bf16.mxu1 %v2956_v32 }
 0x964   : > { %2827 = vmatpush3.bf16.msra.mxu1 %v2956_v32  ;;  %v2190_v32 = vld [vmem:[%s3745_s8] sm:$0x1] (!%p2640_p1) }
 0x965   : > { %2828 = vmatprep.subr.bf16.mxu1 %v2957_v33 }
 0x968   : > { %2829 = vmatpush3.bf16.msra.mxu1 %v2957_v33 }
 0x969   : > { %2830 = vmatprep.subr.bf16.mxu1 %v2958_v34 }
 0x96c   : > { %2831 = vmatpush3.bf16.msra.mxu1 %v2958_v34 }
 0xa2a   : > { %v2810_v37 = vpop.f32.mrb[16].mxu1 }
 0xa2b   : > { %v1892_v40 = vadd.f32 %v2810_v37, %v1447_v35  ;;  %v1876_v42 = vpop.f32.mrb[17].mxu1  ;;  %v2959_v35 = vld [vmem:[%s3371_s11 + $0x30] sm:$0xff]   ;;  %v2623_v37 = vld [vmem:[%s899_s9] ss:$0 sm:$0xff] }
 0xa2c   : > { %v1890_v53 = vadd.f32 %v1876_v42, %v1445_v36  ;;  %v2811_v45 = vpop.f32.mrb[18].mxu1  ;;  %2832 = vmatprep.subr.bf16.mxu1 %v2959_v35  ;;  %v2960_v36 = vld [vmem:[%s3371_s11 + $0x38] sm:$0xff]  }
 0xa2d   : > { %v1879_v46 = vpop.f32.mrb[19].mxu1  ;;  %v3517_v52 = vadd.f32 %v1892_v40, %v3380_v6  ;;  %2833 = vmatpush3.bf16.msra.mxu1 %v2959_v35 }
 0xa2e   : > { %v3514_v47 = vadd.f32 %v1890_v53, %v3378_v5  ;;  %v1891_v51 = vadd.f32 %v1879_v46, %v1446_v43  ;;  %2834 = vmatprep.subr.bf16.mxu1 %v2960_v36 }
 0xa2f   : > { %v1904_v41 = vsel %vm936_vm3, %v3517_v52, 0.0 }
 0xa30   : > { %v3520_v54 = vadd.f32 %v1891_v51, %v3382_v7  ;;  %v1898_v38 = vsel %vm929_vm2, %v3514_v47, 0.0 }
 0xa31   : > { %1899 = vadd.xlane.f32.xlu0 %v1898_v38  ;;  %2835 = vmatpush3.bf16.msra.mxu1 %v2960_v36 }
 0xa32   : > { %v1901_v39 = vsel %vm929_vm2, %v3520_v54, 0.0 }
 0xa33   : > { %1902 = vadd.xlane.f32.xlu1 %v1901_v39 }
 0xa35   : > { %1905 = vadd.xlane.f32.xlu0 %v1904_v41 }
 0xabe   : > { %v1900_v5 = vpop.xlane.xlu0 %1899 }
 0xabf   : > { %v1907_v55 = vmul.f32 0.03125, %v1900_v5 }
 0xac0   : > { %v1903_v48 = vpop.xlane.xlu1 %1902 }
 0xac1   : > { %v1910_v6 = vsub.f32 %v3514_v47, %v1907_v55  ;;  %v1908_v7 = vmul.f32 0.03125, %v1903_v48 }
 0xac2   : > { %v1906_v49 = vpop.xlane.xlu0 %1905 }
 0xac3   : > { %v1911_v50 = vsub.f32 %v3520_v54, %v1908_v7  ;;  %v1909_v56 = vmul.f32 0.03125, %v1906_v49  ;;  %v1913_v57 = vmul.f32 %v1910_v6, %v1910_v6 }
 0xac5   : > { %v1912_v58 = vsub.f32 %v3517_v52, %v1909_v56  ;;  %v1916_v59 = vsel %vm929_vm2, %v1913_v57, 0.0  ;;  %v1914_v60 = vmul.f32 %v1911_v50, %v1911_v50 }
 0xac6   : > { %1917 = vadd.xlane.f32.xlu1 %v1916_v59 }
 0xac7   : > { %v1919_v61 = vsel %vm929_vm2, %v1914_v60, 0.0  ;;  %v1915_v62 = vmul.f32 %v1912_v58, %v1912_v58 }
 0xac8   : > { %1920 = vadd.xlane.f32.xlu0 %v1919_v61 }
 0xac9   : > { %v1922_v63 = vsel %vm936_vm3, %v1915_v62, 0.0 }
 0xaca   : > { %1923 = vadd.xlane.f32.xlu1 %v1922_v63 }
 0xb53   : > { %v1918_v2 = vpop.xlane.xlu1 %1917 }
 0xb54   : > { %v1925_v44 = vmul.f32 0.03125, %v1918_v2  ;;  %v2631_v2 = vld [vmem:[%s907_s28] ss:$0 sm:$0xff] }
 0xb55   : > { %v1921_v3 = vpop.xlane.xlu0 %1920 }
 0xb56   : > { %v1928_v4 = vadd.f32 1e-05, %v1925_v44  ;;  %v1926_v8 = vmul.f32 0.03125, %v1921_v3 }
 0xb57   : > { %v1924_v9 = vpop.xlane.xlu1 %1923 }
 0xb58   : > { %2991 = vrsqrt.f32 %v1928_v4  ;;  %v1929_v10 = vadd.f32 1e-05, %v1926_v8  ;;  %v1927_v11 = vmul.f32 0.03125, %v1924_v9 }
 0xb5a   : > { %2993 = vrsqrt.f32 %v1929_v10  ;;  %v1930_v12 = vadd.f32 1e-05, %v1927_v11 }
 0xb5c   : > { %2995 = vrsqrt.f32 %v1930_v12 }
 0xb62   : > { %v2992_v13 = vpop.eup %2991 }
 0xb63   : > { %v1934_v15 = vmul.f32 %v2992_v13, %v1910_v6 }
 0xb64   : > { %v2994_v16 = vpop.eup %2993 }
 0xb65   : > { %v1935_v17 = vmul.f32 %v2994_v16, %v1911_v50  ;;  %v1943_v18 = vmul.f32 %v2621_v14, %v1934_v15 }
 0xb66   : > { %v2996_v19 = vpop.eup %2995 }
 0xb67   : > { %v1936_v21 = vmul.f32 %v2996_v19, %v1912_v58  ;;  %v1944_v22 = vmul.f32 %v2621_v14, %v1935_v17  ;;  %v1952_v24 = vadd.f32 %v2622_v20, %v1943_v18  ;;  %v2206_v19 = vld [vmem:[%s3742_s23] sm:$0xff] (!%p2640_p1) }
 0xb69   : > { %v1945_v23 = vmul.f32 %v2621_v14, %v1936_v21  ;;  %v1953_v25 = vadd.f32 %v2622_v20, %v1944_v22  ;;  %v3108_v21 = vmov (!%p2640_p1), 0.0|0.0  }
 0xb6a   : > { %2851 = vmatprep.subr.bf16.mxu0 (!%p2640_p1), %v3108_v21 }
 0xb6b   : > { %v1955_v26 = vpack.c.bf16 %v1953_v25, %v1952_v24  ;;  %v1954_v27 = vadd.f32 %v2622_v20, %v1945_v23  ;;  %v2208_v20 = vld [vmem:[%s3743_s19 + $0x10] sm:$0xff] (!%p2640_p1)  ;;  %v2209_v23 = vld [vmem:[%s3743_s19 + $0x18] sm:$0xff] (!%p2640_p1)  ;;  %v3110_v24 = vmov (!%p2640_p1), 0.0  }
 0xb6c   : > { %v2855_v25 = vpack.c.bf16 (!%p2640_p1), %v2209_v23, %v2208_v20 }
 0xb6d   : > { %2816 = vmatprep.mubr.msk.bf16.mxu0 %vm929_vm2, %v1955_v26  ;;  %v1956_v28 = vpack.c.bf16 %v1954_v27, %v1954_v27 }
 0xb6f   : > { %2817 = vmatmul.mubr.msk.bf16.vlgmr.msra.gmra.mrb[28].mxu0 %vm929_vm2, %v1956_v28 }
 0xb70   : > { %2848 = vmatprep.mubr.msk.f32.mxu0 (!%p2640_p1), %vm3109_vm8, %v3110_v24 }
 0xc42   : > { %v2818_v40 = vpop.f32.mrb[28].mxu0 }
 0xc43   : > { %v2029_v42 = vadd.f32 %v2818_v40, %v2623_v37  ;;  %v2020_v43 = vpop.f32.mrb[29].mxu0 }
 0xc44   : > { %v2021_v53 = vadd.f32 %v2623_v37, %v2020_v43  ;;  %v2819_v45 = vpop.f32.mrb[30].mxu0 }
 0xc45   : > { %v2630_v46 = vmul.f32 -1.702, %v2029_v42  ;;  %v2023_v51 = vpop.f32.mrb[31].mxu0 }
 0xc46   : > { %v2628_v38 = vmul.f32 -1.702, %v2021_v53  ;;  %v2024_v39 = vadd.f32 %v2623_v37, %v2023_v51 }
 0xc47   : > { %v2044_v41 = vmul.f32 1.442695, %v2630_v46 }
 0xc48   : > { %v2040_v5 = vmul.f32 1.442695, %v2628_v38  ;;  %v2629_v55 = vmul.f32 -1.702, %v2024_v39 }
 0xc49   : > { %2997 = vpow2.f32 %v2044_v41 }
 0xc4a   : > { %2999 = vpow2.f32 %v2040_v5  ;;  %v2042_v48 = vmul.f32 1.442695, %v2629_v55 }
 0xc4c   : > { %3001 = vpow2.f32 %v2042_v48 }
 0xc53   : > { %v2998_v6 = vpop.eup %2997 }
 0xc54   : > { %v3000_v7 = vpop.eup %2999  ;;  %v2048_v49 = vadd.f32 1.0, %v2998_v6 }
 0xc55   : > { %v2046_v50 = vadd.f32 1.0, %v3000_v7 }
 0xc56   : > { %v3002_v56 = vpop.eup %3001  ;;  %3003 = vrcp.f32 %v2048_v49 }
 0xc57   : > { %3005 = vrcp.f32 %v2046_v50  ;;  %v2047_v57 = vadd.f32 1.0, %v3002_v56 }
 0xc59   : > { %3007 = vrcp.f32 %v2047_v57 }
 0xc60   : > { %v3004_v58 = vpop.eup %3003 }
 0xc61   : > { %v3006_v59 = vpop.eup %3005  ;;  %v2057_v61 = vmul.f32 %v3004_v58, %v2029_v42 }
 0xc62   : > { %v2055_v62 = vmul.f32 %v3006_v59, %v2021_v53 }
 0xc63   : > { %v3008_v60 = vpop.eup %3007  ;;  %v2059_v1 = vpack.c.bf16 %v2057_v61, %v2057_v61 }
 0xc64   : > { %v2056_v63 = vmul.f32 %v3008_v60, %v2024_v39 }
 0xc66   : > { %v2058_v0 = vpack.c.bf16 %v2056_v63, %v2055_v62 }
 0xc68   : > { %2836 = vmatprep.mubr.bf16.mxu1 %v2058_v0 }
 0xc69   : > { %2837 = vmatmul.mubr.bf16.vlgmr.msra.gmra.mrb[20].mxu1 %v2059_v1 }
 0xd3c   : > { %v2838_v44 = vpop.f32.mrb[20].mxu1 }
 0xd3d   : > { %v2174_v3 = vadd.f32 %v2838_v44, %v2631_v2  ;;  %v2165_v4 = vpop.f32.mrb[21].mxu1 }
 0xd3e   : > { %v2166_v8 = vadd.f32 %v2631_v2, %v2165_v4  ;;  %v2839_v9 = vpop.f32.mrb[22].mxu1  ;;  %2188 = sbr.rel (%p2640_p1) target bundleno = 3920 (0xf50), region = 108 }
 0xd3f   : > { %v2181_v10 = vadd.f32 %v2174_v3, %v3517_v52  ;;  %v2168_v11 = vpop.f32.mrb[23].mxu1 }
 0xd40   : > { %v2179_v12 = vadd.f32 %v2166_v8, %v3514_v47  ;;  %v2169_v13 = vadd.f32 %v2631_v2, %v2168_v11 }
 0xd41   : > { %2184 = vst.msk [vmem:[#allocation2 + $0x10] sm:$0x1] %vm936_vm3, %v2181_v10 }
 0xd42   : > { %2182 = vst.msk [vmem:[#allocation2] sm:$0xff] %vm929_vm2, %v2179_v12  ;;  %v2180_v14 = vadd.f32 %v2169_v13, %v3520_v54  ;;  %v2191_v15 = vsel (!%p2640_p1), %vm936_vm3, %v2179_v12, 0.0  ;;  %v2207_v54 = vld [vmem:[%s3743_s19 + $0x8] sm:$0xff] (!%p2640_p1) }
 0xd43   : > { %2192 = vadd.xlane.f32.xlu0 (!%p2640_p1), %v2191_v15  ;;  %v2852_v22 = vpack.c.bf16 (!%p2640_p1), %v2207_v54, %v2206_v19 }
 0xd44   : > { %2183 = vst.msk [vmem:[#allocation2 + $0x8] sm:$0xff] %vm929_vm2, %v2180_v14 }
 0xd45   : > { %2853 = vmatpush3.bf16.msra.mxu0 %v2852_v22 }
 0xd46   : > { %2854 = vmatprep.subr.bf16.mxu0 %v3108_v21 }
 0xd49   : > { %2856 = vmatpush3.bf16.msra.mxu0 %v2855_v25 }
 0xdd0   : > { %v2193_v16 = vpop.xlane.xlu0 %2192 }
 0xdd1   : > { %v2194_v52 = vmul.f32 0.03125, %v2193_v16 }
 0xdd3   : > { %v2195_v17 = vsub.f32 %v2179_v12, %v2194_v52 }
 0xdd5   : > { %v2196_v18 = vmul.f32 %v2195_v17, %v2195_v17 }
 0xdd7   : > { %v2197_v47 = vsel %vm936_vm3, %v2196_v18, 0.0 }
 0xdd8   : > { %2198 = vadd.xlane.f32.xlu0 %v2197_v47 }
 0xe65   : > { %v2199_v26 = vpop.xlane.xlu0 %2198 }
 0xe66   : > { %v2200_v27 = vmul.f32 0.03125, %v2199_v26 }
 0xe68   : > { %v2201_v28 = vadd.f32 1e-05, %v2200_v27 }
 0xe6a   : > { %3009 = vrsqrt.f32 %v2201_v28 }
 0xe74   : > { %v3010_v29 = vpop.eup %3009 }
 0xe75   : > { %v2203_v31 = vmul.f32 %v3010_v29, %v2195_v17 }
 0xe77   : > { %v2204_v33 = vmul.f32 %v2203_v31, %v2189_v30 }
 0xe79   : > { %v2205_v34 = vadd.f32 %v2204_v33, %v2190_v32 }
 0xe7b   : > { %2849 = vmatmul.mubr.msk.f32.vlgmr.msra.gmra.mrb[0].mxu0 %vm929_vm2, %v2205_v34 }
 0xf4e   : > { %v2279_v35 = vpop.f32.mrb[0].mxu0 }
 0xf4f   : > { %2284 = vst.msk [vmem:[%s3375_s15] sm:$0x1] %vm2283_vm9, %v2279_v35  ;;  %v2850_v36 = vpop.f32.mrb[1].mxu0 }
 0xf50 PF: > { %s3746_s21 = sld [smem:[#allocation9_spill]]  ;;  %s3748_s9 = sld [smem:[#allocation35_spill]] }
 0xf51   : > { %s2298_s1 = sshll.u32 %s3375_s15, 4  ;;  %s3749_s28 = sand.u32 1, %s3081_s22   ;;  %s2299_s1 = int_to_ptr.vmem [resolvable:$true] %s2298_s1 }
 0xf52   : > { %s2286_s26 = scalar_lea.sflag [#allocation4], %s3749_s28  ;;  %s3011_s23 = scalar_lea.vmem %s2299_s1, 16 }
 0xf53   : > { %p3012_p2 = scmp.ne.s32.totalorder %s2299_s1, %s3011_s23  ;;  %s3111_s27 = smov [#allocation3]  }
 0xf54   : > { %s3015_s0 = sshll.u32 %s3111_s27, 4  ;;  %s3016_s0 = int_to_ptr.vmem [resolvable:$false] %s3015_s0 }
 0xf55   : > { %p3013_p4 = pnand %p3012_p2, %p3266_p3  ;;  %s3017_s17 = scalar_lea.vmem %s3016_s0, 32 }
 0xf56   : > { %s2642_s2 = sshll.u32 %s3746_s21, 4  ;;  %p3018_p6 = scmp.lt.s32.totalorder %s2299_s1, %s3016_s0 }
 0xf57   : > { %s3599_s11 = scalar_lea.hbm %s3748_s9, %s2642_s2  ;;  %p3014_p5 = pneg %p3013_p4 }
 0xf58   : > { %p3019_p7 = scmp.lt.s32.totalorder %s3017_s17, %s3011_s23 }
 0xf5a   : > { %p3020_p8 = por %p3019_p7, %p3018_p6 }
 0xf5c   : > { %p3021_p10 = pnand %p3020_p8, %p3014_p5 }
 0xf5e   : > { %3024 = shalt.err (!%p3021_p10)
}
 0xf5f   : > { %s3025_s15 = scalar_lea.hbm %s3599_s11, 16  ;;  %s3029_s25 = scalar_lea.hbm %s3748_s9, 32 }
 0xf60   : > { %p3026_p11 = scmp.ne.s32.totalorder %s3599_s11, %s3025_s15  ;;  %p3030_p0 = scmp.lt.u32.totalorder %s3599_s11, %s3748_s9 }
 0xf61   : > { %p3031_p1 = scmp.lt.u32.totalorder %s3029_s25, %s3025_s15  ;;  %p3033_p4 = scmp.lt.u32.totalorder %s3025_s15, %s3599_s11 }
 0xf62   : > { %p3027_p12 = pnand %p3026_p11, %p3266_p3 }
 0xf63   : > { %p3032_p2 = por %p3031_p1, %p3030_p0 }
 0xf64   : > { %p3028_p13 = pneg %p3027_p12 }
 0xf65   : > { %p3034_p5 = por %p3033_p4, %p3032_p2 }
 0xf67   : > { %p3035_p6 = pnand %p3034_p5, %p3028_p13 }
 0xf69   : > { %3038 = shalt.err (!%p3035_p6)
}
 0xf6a   : > { %2862 = dma.vmem_to_hbm [thread:$0]  (%p3266_p3), %s2299_s1, 16, %s3599_s11, %s2286_s26  }
 0xf6b PF: > { %s3750_s24 = sld [smem:[#allocation12_spill]]  ;;  %s3751_s3 = sld [smem:[#allocation6_spill]] }
 0xf71   : > { %p2868_p7 = scmp.ge.s32.totalorder %s3750_s24, 2  ;;  %s2310_s8 = sand.u32 1, %s3751_s3  }
 0xf72   : > { %s2311_s21 = scalar_lea.sflag [#allocation4], %s2310_s8 }
 0xf73   : > { %p2865_p8 = pnand %p2868_p7, %p3276_p9 }
 0xf75   : > { %3072 = dma.done.wait (!%p2865_p8), %s2311_s21, 16  }
 0xf76   : > { %3074 = vsyncadd (!%p2865_p8), %s2311_s21, 4294967280  ;;  %s33_s26 = sadd.s32 1, %s3750_s24   ;;  %s3753_s2 = sld [smem:[#allocation7_spill]] }
 0xf77   : > { %p30_p10 = scmp.ge.s32.totalorder %s33_s26, 6   ;;  %s3754_s23 = sld [smem:[#allocation17_spill]] }
 0xf78   : > { %s3755_s24 = sld [smem:[#allocation10_spill]]  ;;  %s3756_s7 = sld [smem:[#allocation11_spill]] }
 0xf79   : > { %s3757_s25 = sld [smem:[#allocation13_spill]]  ;;  %s3758_s3 = sld [smem:[#allocation15_spill]] }
 0xf7a   : > { %s3759_s1 = smov %s3081_s22  ;;  %32 = sbr.rel (!%p30_p10) target bundleno = 22 (0x16), region = 198 }
 0xf7c   : > { %s3760_s22 = smov %s3753_s2 }
 0xf7e   : > { %s3761_s2 = smov %s3756_s7 }
 0xf81   :  { %2315 = vsyncpa [#allocation4], 1 }
 0xf82   :  { %2317 = vsyncpa [#allocation4 + $0x1], 1 }

</bundles_post_ra>
